<compile_context>
chip_gen: v5e
topology: v5e:2x2
jax: 0.10.0
libtpu: 0.0.40
codegen_flags: <defaults>
</compile_context>

<pallas_src>
import functools

import jax
import jax.numpy as jnp
import numpy as np
from jax.experimental import pallas as pl
from jax.experimental.pallas import tpu as pltpu


def _round_up(v, m):
    return ((v + m - 1) // m) * m


def _sine_layer_kernel(x_ref, w_ref, b_ref, o_ref, *, omega_0):
    # MXU matmul with f32 accumulation; the epilogue (bias, optional scale,
    # sin, cast) runs on the VPU and is the compute bottleneck for small K.
    acc = jnp.dot(x_ref[...], w_ref[...], preferred_element_type=jnp.float32)
    acc = acc + b_ref[...]                         # (tm, tn) + (1, tn) broadcast
    if omega_0 != 1.0:                             # trace-time constant
        acc = acc * jnp.float32(omega_0)
    o_ref[...] = jnp.sin(acc).astype(o_ref.dtype)


def sine_layer(x, w_kn, bias, omega_0=30.0, *, tm=None, tn=None,
               out_dtype=None, use_bf16_inputs=False,
               weight_vmem_budget=8 << 20, vmem_limit_bytes=48 << 20):
    """SIREN sine layer: sin(omega_0 * (x @ w_kn + bias)).

    x:    (M, K)
    w_kn: (K, N) weight, i.e. torch's nn.Linear weight already transposed
          (store it in this layout once; see init_sine_layer_params).
    bias: (N,)

    Preferred path: fold omega_0 into the parameters once at init time
    (W' = omega_0*W, b' = omega_0*b) and call with omega_0=1.0 so the
    per-element multiply is skipped.
    """
    M, K = x.shape
    Kw, N = w_kn.shape
    assert Kw == K, f"weight K {Kw} != x K {K}"
    assert bias.shape == (N,)

    if out_dtype is None:
        out_dtype = x.dtype

    # ---- lane-dense N: pad only the (small) weight/bias, never x/out rows. --
    N_pad = max(_round_up(N, 128), 128)

    x_isz = 2 if use_bf16_inputs else np.dtype(x.dtype).itemsize
    w_isz = 2 if use_bf16_inputs else np.dtype(w_kn.dtype).itemsize
    o_isz = np.dtype(out_dtype).itemsize

    # ---- N tiling: keep the full (K, N) weight resident whenever it fits. ---
    if tn is not None:
        tn = _round_up(tn, 128)
        N_pad = _round_up(N_pad, tn)
    elif K * N_pad * w_isz <= weight_vmem_budget:
        tn = N_pad                                   # resident weight, grid_n=1
    else:
        # Largest 128-multiple divisor of N_pad whose (K, tn) slab fits the
        # budget: no over-padding (the old hard 512 cap padded 1280 -> 1536).
        n_blocks = N_pad // 128
        tn = 128
        for d in range(1, n_blocks + 1):
            if n_blocks % d == 0 and K * d * 128 * w_isz <= weight_vmem_budget:
                tn = d * 128
    grid_n = N_pad // tn

    # ---- pad/cast the small operands; x is passed through untouched. --------
    wp = w_kn if N_pad == N else jnp.pad(w_kn, ((0, 0), (0, N_pad - N)))
    bp = bias if N_pad == N else jnp.pad(bias, (0, N_pad - N))
    bp = bp.reshape(1, N_pad).astype(jnp.float32)
    xp = x
    if use_bf16_inputs:
        # HBM-bound regime: halve streamed bytes; accumulate/bias/sin stay f32.
        xp = xp.astype(jnp.bfloat16)
        wp = wp.astype(jnp.bfloat16)

    # ---- M tiling: no host-side pad; Pallas masks the ragged edge block. ----
    if M < 8:
        xp = jnp.pad(xp, ((0, 8 - M), (0, 0)))      # tiny batch: one sublane
        M_rows = 8
    else:
        M_rows = M
    tm_cap = (M_rows // 8) * 8                       # keep block <= array rows
    if tm is None:
        tm = min(1024, tm_cap)
        if grid_n == 1 and tm >= M_rows and M_rows >= 256:
            # Guarantee >= 2 grid steps so both v7x TensorCores get work;
            # the ~0.35us extra step is negligible on single-TC v5e/v6e.
            tm = _round_up(M_rows // 2, 8)
    else:
        tm = max(8, min(_round_up(tm, 8), tm_cap))

    # ---- VMEM fit: shrink tm instead of relying on the scoped limit. --------
    def _vmem_estimate(tm_):
        wbufs = 1 if grid_n == 1 else 2
        return (2 * tm_ * K * x_isz                       # x (double-buffered)
                + wbufs * (K * tn * w_isz + tn * 4)       # weight + bias
                + 2 * tm_ * tn * o_isz                    # output (double-buffered)
                + 3 * tm_ * tn * 4)                       # f32 acc/sin temporaries
    while _vmem_estimate(tm) > (3 * vmem_limit_bytes) // 4 and tm > 256:
        tm = _round_up(tm // 2, 8)

    grid_m = pl.cdiv(M_rows, tm)
    kernel = functools.partial(_sine_layer_kernel, omega_0=float(omega_0))
    resident = pl.Buffered(1)        # grid-invariant blocks: no second buffer

    if grid_n == 1:
        grid = (grid_m,)
        in_specs = [
            pl.BlockSpec((tm, K), lambda i: (i, 0)),                           # x rows
            pl.BlockSpec((K, tn), lambda i: (0, 0), pipeline_mode=resident),   # weight
            pl.BlockSpec((1, tn), lambda i: (0, 0), pipeline_mode=resident),   # bias
        ]
        out_specs = pl.BlockSpec((tm, tn), lambda i: (i, 0))
        dim_sem = ("parallel",)
    else:
        # N must be tiled: pick the grid order so the LARGER operand is the
        # one streamed only once (previously x was re-read grid_n times).
        x_hbm = M_rows * K * x_isz
        w_hbm = K * N_pad * w_isz
        if (grid_m - 1) * w_hbm <= (grid_n - 1) * x_hbm:
            # M outer: x read once; the smaller weight re-read grid_m times.
            grid = (grid_m, grid_n)
            in_specs = [
                pl.BlockSpec((tm, K), lambda i, j: (i, 0)),
                pl.BlockSpec((K, tn), lambda i, j: (0, j)),
                pl.BlockSpec((1, tn), lambda i, j: (0, j)),
            ]
            out_specs = pl.BlockSpec((tm, tn), lambda i, j: (i, j))
        else:
            # N outer: weight read once (changes only at outer steps -> single
            # buffer is enough); x re-read grid_n times.
            grid = (grid_n, grid_m)
            in_specs = [
                pl.BlockSpec((tm, K), lambda j, i: (i, 0)),
                pl.BlockSpec((K, tn), lambda j, i: (0, j), pipeline_mode=resident),
                pl.BlockSpec((1, tn), lambda j, i: (0, j), pipeline_mode=resident),
            ]
            out_specs = pl.BlockSpec((tm, tn), lambda j, i: (i, j))
        dim_sem = ("parallel", "parallel")

    out = pl.pallas_call(
        kernel,
        out_shape=jax.ShapeDtypeStruct((M_rows, N_pad), out_dtype),
        grid_spec=pltpu.PrefetchScalarGridSpec(
            num_scalar_prefetch=0,
            grid=grid,
            in_specs=in_specs,
            out_specs=out_specs,
        ),
        compiler_params=pltpu.CompilerParams(
            dimension_semantics=dim_sem,
            vmem_limit_bytes=vmem_limit_bytes,
        ),
    )(xp, wp, bp)

    if M_rows != M or N_pad != N:
        out = out[:M, :N]        # only when N % 128 != 0 or batch < 8
    return out


def init_sine_layer_params(key, in_features, out_features, is_first, omega_0,
                           fold_omega=False):
    """SIREN init matching SineLayer.init_weights(); weight stored as (K, N).

    With fold_omega=True the returned params are pre-multiplied by omega_0
    (a one-time transform) so the kernel can be called with omega_0=1.0.
    """
    kw, kb = jax.random.split(key)
    if is_first:
        bound_w = 1.0 / in_features
    else:
        bound_w = np.sqrt(6.0 / in_features) / omega_0
    # Stored directly in (in_features, out_features) = (K, N) layout so the
    # kernel never pays a per-call HBM transpose.
    w_kn = jax.random.uniform(
        kw, (in_features, out_features), jnp.float32, -bound_w, bound_w
    )
    # nn.Linear default bias init: uniform(-1/sqrt(in), 1/sqrt(in))
    bound_b = 1.0 / np.sqrt(in_features)
    bias = jax.random.uniform(kb, (out_features,), jnp.float32, -bound_b, bound_b)
    if fold_omega:
        w_kn = omega_0 * w_kn
        bias = omega_0 * bias
    return w_kn, bias


if __name__ == "__main__":
    key = jax.random.PRNGKey(0)
    k1, k2, k3, k4, k5, k6 = jax.random.split(key, 6)
    omega_0 = 30.0

    # Case 1: original small demo (N=32 -> weight/bias lane-padded to 128
    # inside the wrapper), omega_0 applied inside the kernel (unfolded path).
    batch, in_f, out_f = 64, 16, 32
    x = jax.random.uniform(k1, (batch, in_f), jnp.float32, -1.0, 1.0)
    w, b = init_sine_layer_params(k2, in_f, out_f, is_first=True, omega_0=omega_0)
    y = sine_layer(x, w, b, omega_0)
    jax.block_until_ready(y)
    y_ref = jnp.sin(omega_0 * (x @ w + b))
    np.testing.assert_allclose(np.asarray(y), np.asarray(y_ref), rtol=1e-5, atol=1e-5)

    # Case 2: wider hidden layer, N=1280 (already a 128-multiple -> no padding,
    # no output slice, single resident weight tile), ragged M, omega_0 folded
    # into the parameters at "init time" (preferred path, no in-kernel scale).
    batch2, in2, out2 = 200, 48, 1280
    x2 = jax.random.uniform(k3, (batch2, in2), jnp.float32, -1.0, 1.0)
    w2, b2 = init_sine_layer_params(k4, in2, out2, is_first=False, omega_0=omega_0)
    w2f, b2f = omega_0 * w2, omega_0 * b2            # one-time fold
    y2 = sine_layer(x2, w2f, b2f, omega_0=1.0)
    jax.block_until_ready(y2)
    y2_ref = jnp.sin(omega_0 * (x2 @ w2 + b2))
    np.testing.assert_allclose(np.asarray(y2), np.asarray(y2_ref), rtol=1e-4, atol=1e-4)

    # Case 3: force the N-tiled fallback (tiny weight budget) plus a ragged M
    # edge block, exercising the multi-tile grid and write masking.
    batch3, in3, out3 = 100, 64, 512
    x3 = jax.random.uniform(k5, (batch3, in3), jnp.float32, -1.0, 1.0)
    w3, b3 = init_sine_layer_params(k6, in3, out3, is_first=False, omega_0=omega_0)
    y3 = sine_layer(x3, w3, b3, omega_0, weight_vmem_budget=64 << 10)
    jax.block_until_ready(y3)
    y3_ref = jnp.sin(omega_0 * (x3 @ w3 + b3))
    np.testing.assert_allclose(np.asarray(y3), np.asarray(y3_ref), rtol=1e-4, atol=1e-4)

    print("KERNEL_OK")
</pallas_src>

<mosaic_0001>
module attributes {stable_mosaic.version = 11 : i64} {
  func.func @_sine_layer_kernel(%arg0: i32, %arg1: memref<64x16xf32, #tpu.memory_space<vmem>>, %arg2: memref<16x128xf32, #tpu.memory_space<vmem>>, %arg3: memref<1x128xf32, #tpu.memory_space<vmem>>, %arg4: memref<64x128xf32, #tpu.memory_space<vmem>>) attributes {dimension_semantics = [#tpu.dimension_semantics<parallel>], iteration_bounds = array<i64: 1>, scalar_prefetch = 0 : i64, scratch_operands = 0 : i64, tpu.core_type = #tpu.core_type<tc>, window_params = [{transform_indices = @transform_0, window_bounds = array<i64: 64, 16>}, {pipeline_mode = #tpu.pipeline_mode<synchronous>, transform_indices = @transform_1, window_bounds = array<i64: 16, 128>}, {pipeline_mode = #tpu.pipeline_mode<synchronous>, transform_indices = @transform_2, window_bounds = array<i64: 1, 128>}, {transform_indices = @transform_3, window_bounds = array<i64: 64, 128>}]} {
    %c0 = arith.constant 0 : index
    %c0_0 = arith.constant 0 : index
    %0 = vector.load %arg1[%c0, %c0_0] : memref<64x16xf32, #tpu.memory_space<vmem>>, vector<64x16xf32>
    %c0_1 = arith.constant 0 : index
    %c0_2 = arith.constant 0 : index
    %1 = vector.load %arg2[%c0_1, %c0_2] : memref<16x128xf32, #tpu.memory_space<vmem>>, vector<16x128xf32>
    %cst = arith.constant dense<0.000000e+00> : vector<64x128xf32>
    %2 = tpu.matmul %0, %1, %cst {dimension_numbers = #tpu.dot_dimension_numbers<[1], [0], [0], [1], [0, 0, 1, 1], [], []>} : vector<64x16xf32>, vector<16x128xf32>, vector<64x128xf32> -> vector<64x128xf32>
    %c0_3 = arith.constant 0 : index
    %c0_4 = arith.constant 0 : index
    %3 = vector.load %arg3[%c0_3, %c0_4] : memref<1x128xf32, #tpu.memory_space<vmem>>, vector<1x128xf32>
    %4 = vector.broadcast %3 : vector<1x128xf32> to vector<64x128xf32>
    %5 = arith.addf %2, %4 : vector<64x128xf32>
    %cst_5 = arith.constant 3.000000e+01 : f32
    %6 = vector.broadcast %cst_5 : f32 to vector<64x128xf32>
    %7 = arith.mulf %5, %6 : vector<64x128xf32>
    %8 = math.sin %7 : vector<64x128xf32>
    %c0_6 = arith.constant 0 : index
    %c0_7 = arith.constant 0 : index
    %9 = vector.load %arg4[%c0_6, %c0_7] : memref<64x128xf32, #tpu.memory_space<vmem>>, vector<64x128xf32>
    tpu.vector_store %arg4[%c0_6, %c0_7], %8 {strides = array<i32>} : memref<64x128xf32, #tpu.memory_space<vmem>>, vector<64x128xf32>,
    return
  }
  func.func @transform_0(%arg0: i32) -> (i32, i32) {
    %c0_i32 = arith.constant 0 : i32
    %c0_i32_0 = arith.constant 0 : i32
    return %arg0, %c0_i32 : i32, i32
  }
  func.func @transform_1(%arg0: i32) -> (i32, i32) {
    %c0_i32 = arith.constant 0 : i32
    %c0_i32_0 = arith.constant 0 : i32
    %c0_i32_1 = arith.constant 0 : i32
    return %c0_i32, %c0_i32_0 : i32, i32
  }
  func.func @transform_2(%arg0: i32) -> (i32, i32) {
    %c0_i32 = arith.constant 0 : i32
    %c0_i32_0 = arith.constant 0 : i32
    %c0_i32_1 = arith.constant 0 : i32
    return %c0_i32, %c0_i32_0 : i32, i32
  }
  func.func @transform_3(%arg0: i32) -> (i32, i32) {
    %c0_i32 = arith.constant 0 : i32
    %c0_i32_0 = arith.constant 0 : i32
    return %arg0, %c0_i32 : i32, i32
  }
}

</mosaic_0001>

<bundles_post_ra>
// kernel: tpu_custom_call.1
= control target key start
LH: loop header
LB: loop body
LE: loop exit
PB: predicated region body
PF: predicated region fallthrough
CT: control target
= control target key end

     0   :  { %vm29_vm0 = vcmask 130048   ;;  %s2316_s0 = inlined_call_operand.vmem [shape: f32[64,16], index: 0, kind: input, shape index: {}]   ;;  %s2317_s1 = inlined_call_operand.vmem [shape: f32[16,128], index: 1, kind: input, shape index: {}]   ;;  %s2318_s2 = inlined_call_operand.vmem [shape: f32[1,128], index: 2, kind: input, shape index: {}]   ;;  %s2319_s3 = inlined_call_operand.hbm [shape: f32[64,128], index: 3, kind: output, shape index: {}]  }
   0x1   :  { %v24_v0 = vld [vmem:[%s2317_s1 + $0x8] sm:$0xff]  ;;  %v23_v1 = vld [vmem:[%s2317_s1] sm:$0xff]  ;;  %v17_v3 = vld [vmem:[%s2316_s0 + $0x10] sm:$0xff] }
   0x2   :  { %68 = vmatpush.msra.mxu0 %v24_v0  ;;  %1401 = vmatpush.msra.mxu1 %v24_v0  ;;  %v15_v2 = vld [vmem:[%s2316_s0] sm:$0xff]  ;;  %v21_v5 = vld [vmem:[%s2316_s0 + $0x30] sm:$0xff] }
   0x3   :  { %1402 = vmatpush.msra.mxu2 %v24_v0  ;;  %1403 = vmatpush.msra.mxu3 %v24_v0  ;;  %v19_v4 = vld [vmem:[%s2316_s0 + $0x20] sm:$0xff] }
   0x4   :  { %69 = vmatpush.msra.mxu0 %v23_v1  ;;  %1404 = vmatpush.msra.mxu1 %v23_v1 }
   0x5   :  { %1405 = vmatpush.msra.mxu2 %v23_v1  ;;  %1406 = vmatpush.msra.mxu3 %v23_v1 }
   0x6   :  { %8 = vsyncpa [#allocation3], 0  ;;  %1369 = vmatmul.msk.f32.vlgmr.msra.gmra.mxu0 %vm29_vm0, %v15_v2  ;;  %1371 = vmatmul.msk.f32.vlgmr.msra.gmra.mxu1 %vm29_vm0, %v17_v3  ;;  %v16_v6 = vld [vmem:[%s2316_s0 + $0x8] sm:$0xff]  ;;  %v18_v7 = vld [vmem:[%s2316_s0 + $0x18] sm:$0xff]  ;;  %v1445_v41 = vmov 683565275  }
   0x7   :  { %1373 = vmatmul.msk.f32.vlgmr.msra.gmra.mxu2 %vm29_vm0, %v19_v4  ;;  %1375 = vmatmul.msk.f32.vlgmr.msra.gmra.mxu3 %vm29_vm0, %v21_v5  ;;  %v20_v8 = vld [vmem:[%s2316_s0 + $0x28] sm:$0xff]  ;;  %v22_v9 = vld [vmem:[%s2316_s0 + $0x38] sm:$0xff]  ;;  %v1516_v10 = vld [vmem:[%s2318_s2] ss:$0 sm:$0xff]  ;;  %v1446_v43 = vmov 2475754826  }
   0x8   :  { %v1447_v45 = vmov 2131351028   ;;  %v1448_v47 = vmov 2102212464   ;;  %v1449_v49 = vmov 920167782  }
   0x9   :  { %v1450_v58 = vmov 1326507024   ;;  %s1357_s10 = sshll.u32 %s2319_s3, 4  ;;  %s1453_s11 = smov 128   ;;  %s1358_s10 = int_to_ptr.hbm [resolvable:$true] %s1357_s10 }
   0xa   :  { %s1454_s12 = smov 8  }
   0xe   :  { %1370 = vmatmul.msk.f32.gmra.mxu0 %vm29_vm0, %v16_v6  ;;  %1372 = vmatmul.msk.f32.gmra.mxu1 %vm29_vm0, %v18_v7 }
   0xf   :  { %1374 = vmatmul.msk.f32.gmra.mxu2 %vm29_vm0, %v20_v8  ;;  %1376 = vmatmul.msk.f32.gmra.mxu3 %vm29_vm0, %v22_v9 }
  0x83   :  { %v71_v11 = vpop.f32.mrf.mxu0  ;;  %v77_v12 = vpop.f32.mrf.mxu1 }
  0x84   :  { %v72_v13 = vadd.f32 %v1516_v10, %v71_v11  ;;  %v78_v14 = vadd.f32 %v1516_v10, %v77_v12 }
  0x86   :  { %v1520_v15 = vmul.f32 30.0, %v72_v13  ;;  %v1522_v16 = vmul.f32 30.0, %v78_v14 }
  0x88   :  { %v103_v17 = vand.u32 2147483647, %v1520_v15  ;;  %v106_v18 = vand.u32 2139095040, %v1520_v15  ;;  %v413_v19 = vand.u32 2147483647, %v1522_v16  ;;  %v416_v20 = vand.u32 2139095040, %v1522_v16 }
  0x8a   :  { %v107_v21 = vshrl.u32 %v106_v18, 23  ;;  %v110_v22 = vand.u32 8388607, %v103_v17  ;;  %v417_v23 = vshrl.u32 %v416_v20, 23  ;;  %v83_v25 = vpop.f32.mrf.mxu2  ;;  %v420_v28 = vand.u32 8388607, %v413_v19 }
  0x8b   :  { %v84_v31 = vadd.f32 %v1516_v10, %v83_v25 }
  0x8c   :  { %v1377_v24 = vadd.s32 4294967169, %v107_v21  ;;  %v111_v26 = vor.u32 8388608, %v110_v22  ;;  %v1383_v27 = vadd.s32 4294967169, %v417_v23  ;;  %v421_v34 = vor.u32 8388608, %v420_v28 }
  0x8d   :  { %v1539_v39 = vmul.f32 30.0, %v84_v31 }
  0x8e   :  { %v113_v29 = vadd.s32 1, %v1377_v24  ;;  %v423_v30 = vadd.s32 1, %v1383_v27  ;;  %v1533_v33 = vshll.u32 %v111_v26, 8  ;;  %v1547_v52 = vshll.u32 %v421_v34, 8 }
  0x8f   :  { %v726_v2 = vand.u32 2139095040, %v1539_v39 }
  0x90   :  { %vm114_vm1 = vcmp.gt.s32.totalorder %v113_v29, 0  ;;  %vm424_vm2 = vcmp.gt.s32.totalorder %v423_v30, 0  ;;  %v152_v51 = vand.u32 65535, %v1533_v33  ;;  %v153_v56 = vshrl.u32 %v1533_v33, 16 }
  0x91   :  { %v115_v32 = vsel %vm114_vm1, %v113_v29, 0  ;;  %v425_v36 = vsel %vm424_vm2, %v423_v30, 0  ;;  %v1591_v22 = vand.u32 65535, %v1547_v52 }
  0x92   :  { %v117_v35 = vand.u32 31, %v115_v32  ;;  %v1535_v37 = vshrl.u32 %v115_v32, 5  ;;  %v1537_v38 = vand.u32 31, %v425_v36  ;;  %v1597_v29 = vshrl.u32 %v425_v36, 5 }
  0x94   :  { %v118_v40 = vsub.s32 32, %v117_v35  ;;  %v120_v42 = vshll.u32 %v1445_v41, %v117_v35  ;;  %v123_v44 = vshll.u32 %v1446_v43, %v117_v35  ;;  %v126_v46 = vshll.u32 %v1447_v45, %v117_v35 }
  0x95   :  { %v129_v48 = vshll.u32 %v1448_v47, %v117_v35  ;;  %v132_v50 = vshll.u32 %v1449_v49, %v117_v35  ;;  %vm135_vm3 = vcmp.lt.s32.totalorder %v1535_v37, 1  ;;  %vm138_vm4 = vcmp.lt.s32.totalorder %v1535_v37, 4 }
  0x96   :  { %v121_v53 = vshrl.u32 %v1446_v43, %v118_v40  ;;  %v124_v54 = vshrl.u32 %v1447_v45, %v118_v40  ;;  %v127_v55 = vshrl.u32 %v1448_v47, %v118_v40  ;;  %v130_v57 = vshrl.u32 %v1449_v49, %v118_v40 }
  0x97   :  { %v133_v59 = vshrl.u32 %v1450_v58, %v118_v40  ;;  %v1558_v63 = vsub.s32 32, %v1537_v38  ;;  %vm137_vm5 = vcmp.lt.s32.totalorder %v1535_v37, 3  ;;  %v119_v3 = vshrl.u32 %v1445_v41, %v118_v40 }
  0x98   :  { %v122_v60 = vor.u32 %v121_v53, %v120_v42  ;;  %v125_v61 = vor.u32 %v124_v54, %v123_v44  ;;  %v128_v62 = vor.u32 %v127_v55, %v126_v46  ;;  %v131_v0 = vor.u32 %v130_v57, %v129_v48 }
  0x99   :  { %v134_v1 = vor.u32 %v133_v59, %v132_v50  ;;  %vm136_vm6 = vcmp.lt.s32.totalorder %v1535_v37, 2  ;;  %v430_v8 = vshll.u32 %v1445_v41, %v1537_v38  ;;  %v433_v9 = vshll.u32 %v1446_v43, %v1537_v38 }
  0x9a   :  { %v143_v4 = vsel %vm135_vm3, %v122_v60, %v125_v61  ;;  %v147_v5 = vsel %vm135_vm3, %v125_v61, %v128_v62  ;;  %v144_v6 = vsel %vm138_vm4, %v131_v0, 920167782  ;;  %v140_v11 = vsel %vm138_vm4, %v128_v62, 2102212464 }
  0x9b   :  { %v148_v7 = vsel %vm138_vm4, %v134_v1, 1326507024  ;;  %v145_v12 = vsel %vm137_vm5, %v128_v62, %v144_v6  ;;  %v431_v14 = vshrl.u32 %v1446_v43, %v1558_v63  ;;  %v434_v21 = vshrl.u32 %v1447_v45, %v1558_v63 }
  0x9c   :  { %v149_v13 = vsel %vm137_vm5, %v131_v0, %v148_v7  ;;  %v146_v18 = vsel %vm136_vm6, %v143_v4, %v145_v12  ;;  %v139_v27 = vsel %vm135_vm3, %v119_v3, %v122_v60  ;;  %v141_v28 = vsel %vm137_vm5, %v125_v61, %v140_v11 }
  0x9d   :  { %v150_v20 = vsel %vm136_vm6, %v147_v5, %v149_v13  ;;  %v176_v25 = vand.u32 65535, %v146_v18  ;;  %v177_v26 = vshrl.u32 %v146_v18, 16  ;;  %v1599_v30 = vor.u32 %v431_v14, %v430_v8 }
  0x9e   :  { %v154_v23 = vand.u32 65535, %v150_v20  ;;  %v155_v24 = vshrl.u32 %v150_v20, 16  ;;  %v1601_v34 = vor.u32 %v434_v21, %v433_v9  ;;  %v436_v35 = vshll.u32 %v1447_v45, %v1537_v38 }
  0x9f   :  { %v179_v42 = vmul.u32 %v177_v26, %v152_v51  ;;  %v180_v44 = vmul.u32 %v176_v25, %v153_v56  ;;  %v437_v46 = vshrl.u32 %v1448_v47, %v1558_v63  ;;  %v178_v53 = vmul.u32 %v176_v25, %v152_v51 }
  0xa0   :  { %v157_v31 = vmul.u32 %v155_v24, %v152_v51  ;;  %v158_v32 = vmul.u32 %v154_v23, %v153_v56  ;;  %v156_v40 = vmul.u32 %v154_v23, %v152_v51  ;;  %v159_v48 = vmul.u32 %v155_v24, %v153_v56 }
  0xa1   :  { %v181_v36 = vmul.u32 %v177_v26, %v153_v56  ;;  %v182_v59 = vshll.u32 %v179_v42, 16  ;;  %v184_v61 = vshll.u32 %v180_v44, 16  ;;  %v439_v62 = vshll.u32 %v1448_v47, %v1537_v38 }
  0xa2   :  { %v160_v50 = vshll.u32 %v157_v31, 16  ;;  %v161_v54 = vshrl.u32 %v157_v31, 16  ;;  %v162_v55 = vshll.u32 %v158_v32, 16  ;;  %v163_v57 = vshrl.u32 %v158_v32, 16 }
  0xa3   :  { %v1451_v0 = vmov 0   ;;  %vm186_vm8 = vc.u32 %v178_v53, %v182_v59  ;;  %v188_v3 = vadd.s32 %v182_v59, %v178_v53  ;;  %v440_v4 = vshrl.u32 %v1449_v49, %v1558_v63 }
  0xa4   :  { %vm164_vm7 = vc.u32 %v156_v40, %v160_v50  ;;  %v166_v60 = vadd.s32 %v160_v50, %v156_v40  ;;  %v187_v56 = vsel %vm186_vm8, 1, %v1451_v0  ;;  %v442_v5 = vshll.u32 %v1449_v49, %v1537_v38 }
  0xa5   :  { %v165_v1 = vsel %vm164_vm7, 1, %v1451_v0  ;;  %v189_v7 = vadd.s32 %v187_v56, %v181_v36  ;;  %vm190_vm10 = vc.u32 %v188_v3, %v184_v61  ;;  %v438_v8 = vor.u32 %v437_v46, %v436_v35 }
  0xa6   :  { %v167_v51 = vadd.s32 %v165_v1, %v159_v48  ;;  %vm168_vm9 = vc.u32 %v166_v60, %v162_v55  ;;  %v191_v11 = vsel %vm190_vm10, 1, %v1451_v0  ;;  %v441_v12 = vor.u32 %v440_v4, %v439_v62 }
  0xa7   :  { %v169_v6 = vsel %vm168_vm9, 1, %v1451_v0  ;;  %v443_v13 = vshrl.u32 %v1450_v58, %v1558_v63  ;;  %v183_v14 = vshrl.u32 %v179_v42, 16  ;;  %v193_v18 = vadd.s32 %v191_v11, %v189_v7 }
  0xa8   :  { %v171_v9 = vadd.s32 %v169_v6, %v167_v51  ;;  %vm445_vm11 = vcmp.lt.s32.totalorder %v1597_v29, 1  ;;  %vm447_vm12 = vcmp.lt.s32.totalorder %v1597_v29, 3  ;;  %v185_v38 = vshrl.u32 %v180_v44, 16 }
  0xa9   :  { %v444_v21 = vor.u32 %v443_v13, %v442_v5  ;;  %vm448_vm13 = vcmp.lt.s32.totalorder %v1597_v29, 4  ;;  %v1622_v23 = vadd.s32 %v188_v3, %v184_v61  ;;  %v194_v24 = vadd.s32 %v193_v18, %v183_v14 }
  0xaa   :  { %v172_v20 = vadd.s32 %v171_v9, %v161_v54  ;;  %v453_v25 = vsel %vm445_vm11, %v1599_v30, %v1601_v34  ;;  %v454_v26 = vsel %vm448_vm13, %v441_v12, 920167782  ;;  %vm446_vm14 = vcmp.lt.s32.totalorder %v1597_v29, 2 }
  0xab   :  { %v455_v32 = vsel %vm447_vm12, %v438_v8, %v454_v26  ;;  %v457_v35 = vsel %vm445_vm11, %v1601_v34, %v438_v8  ;;  %v142_v40 = vsel %vm136_vm6, %v139_v27, %v141_v28  ;;  %v195_v42 = vadd.s32 %v194_v24, %v185_v38 }
  0xac   :  { %v1630_v31 = vadd.s32 %v172_v20, %v163_v57  ;;  %v456_v44 = vsel %vm446_vm14, %v453_v25, %v455_v32  ;;  %v458_v46 = vsel %vm448_vm13, %v444_v21, 1326507024  ;;  %v463_v50 = vshrl.u32 %v1547_v52, 16 }
  0xad   :  { %v459_v48 = vsel %vm447_vm12, %v441_v12, %v458_v46  ;;  %v486_v53 = vand.u32 65535, %v456_v44  ;;  %v199_v36 = vadd.s32 1, %v195_v42  ;;  %v487_v27 = vshrl.u32 %v456_v44, 16 }
  0xae   :  { %vm198_vm15 = vc.u32 %v1630_v31, %v1622_v23  ;;  %v460_v37 = vsel %vm446_vm14, %v457_v35, %v459_v48  ;;  %v727_v28 = vshrl.u32 %v726_v2, 23  ;;  %v196_v54 = vmul.u32 %v1533_v33, %v142_v40 }
  0xaf   :  { %v464_v55 = vand.u32 65535, %v460_v37  ;;  %v465_v57 = vshrl.u32 %v460_v37, 16  ;;  %v723_v59 = vand.u32 2147483647, %v1539_v39  ;;  %v200_v60 = vsel %vm198_vm15, %v199_v36, %v195_v42 }
  0xb0   :  { %v429_v61 = vshrl.u32 %v1445_v41, %v1558_v63  ;;  %v489_v62 = vmul.u32 %v487_v27, %v1591_v22  ;;  %v490_v1 = vmul.u32 %v486_v53, %v463_v50  ;;  %v201_v3 = vadd.s32 %v200_v60, %v196_v54 }
  0xb1   :  { %v450_v4 = vsel %vm448_vm13, %v438_v8, 2102212464  ;;  %v467_v51 = vmul.u32 %v465_v57, %v1591_v22  ;;  %v468_v2 = vmul.u32 %v464_v55, %v463_v50  ;;  %v488_v33 = vmul.u32 %v486_v53, %v1591_v22 }
  0xb2   :  { %v491_v56 = vmul.u32 %v487_v27, %v463_v50  ;;  %v492_v5 = vshll.u32 %v489_v62, 16  ;;  %v1389_v6 = vadd.s32 4294967169, %v727_v28  ;;  %v202_v7 = vadd.s32 536870912, %v201_v3 }
  0xb3   :  { %v466_v9 = vmul.u32 %v464_v55, %v1591_v22  ;;  %v469_v11 = vmul.u32 %v465_v57, %v463_v50  ;;  %v470_v63 = vshll.u32 %v467_v51, 16  ;;  %v472_v12 = vshll.u32 %v468_v2, 16 }
  0xb4   :  { %v494_v13 = vshll.u32 %v490_v1, 16  ;;  %vm496_vm0 = vc.u32 %v488_v33, %v492_v5  ;;  %v498_v14 = vadd.s32 %v492_v5, %v488_v33  ;;  %v203_v18 = vshrl.u32 %v202_v7, 30 }
  0xb5   :  { %vm474_vm1 = vc.u32 %v466_v9, %v470_v63  ;;  %v476_v8 = vadd.s32 %v470_v63, %v466_v9  ;;  %v497_v20 = vsel %vm496_vm0, 1, %v1451_v0  ;;  %v730_v24 = vand.u32 8388607, %v723_v59 }
  0xb6   :  { %v475_v38 = vsel %vm474_vm1, 1, %v1451_v0  ;;  %v499_v21 = vadd.s32 %v497_v20, %v491_v56  ;;  %vm500_vm2 = vc.u32 %v498_v14, %v494_v13  ;;  %v204_v25 = vshll.u32 %v203_v18, 30 }
  0xb7   :  { %v449_v22 = vsel %vm445_vm11, %v429_v61, %v1599_v30  ;;  %v477_v26 = vadd.s32 %v475_v38, %v469_v11  ;;  %vm478_vm3 = vc.u32 %v476_v8, %v472_v12  ;;  %v451_v32 = vsel %vm447_vm12, %v1601_v34, %v450_v4 }
  0xb8   :  { %v479_v35 = vsel %vm478_vm3, 1, %v1451_v0  ;;  %v501_v40 = vsel %vm500_vm2, 1, %v1451_v0  ;;  %v733_v42 = vadd.s32 1, %v1389_v6  ;;  %v205_v44 = vsub.s32 %v201_v3, %v204_v25 }
  0xb9   :  { %v471_v46 = vshrl.u32 %v467_v51, 16  ;;  %v481_v48 = vadd.s32 %v479_v35, %v477_v26  ;;  %v503_v50 = vadd.s32 %v501_v40, %v499_v21  ;;  %vm105_vm4 = vcmp.lt.s32.totalorder %v1520_v15, 0 }
  0xba   :  { %v227_v53 = vsub.s32 4, %v203_v18  ;;  %v493_v36 = vshrl.u32 %v489_v62, 16  ;;  %vm734_vm5 = vcmp.gt.s32.totalorder %v733_v42, 0  ;;  %vm206_vm6 = vcmp.lt.s32.totalorder %v205_v44, 0 }
  0xbb   :  { %v207_v30 = vsub.s32 0, %v205_v44  ;;  %v473_v37 = vshrl.u32 %v468_v2, 16  ;;  %v482_v27 = vadd.s32 %v481_v48, %v471_v46  ;;  %v452_v34 = vsel %vm446_vm14, %v449_v22, %v451_v32 }
  0xbc   :  { %v495_v28 = vshrl.u32 %v490_v1, 16  ;;  %v504_v54 = vadd.s32 %v503_v50, %v493_v36  ;;  %v735_v55 = vsel %vm734_vm5, %v733_v42, 0  ;;  %v1680_v61 = vadd.s32 %v498_v14, %v494_v13 }
  0xbd   :  { %v208_v57 = vsel %vm206_vm6, %v207_v30, %v205_v44  ;;  %v1678_v60 = vadd.s32 %v482_v27, %v473_v37  ;;  %v731_v3 = vor.u32 8388608, %v730_v24  ;;  %v228_v62 = vsel %vm105_vm4, %v227_v53, %v203_v18 }
  0xbe   :  { %v209_v4 = vclz %v208_v57  ;;  %v505_v51 = vadd.s32 %v504_v54, %v495_v28  ;;  %v737_v33 = vand.u32 31, %v735_v55  ;;  %vm1686_vm7 = vcmp.le.f32.partialorder %v103_v17, 0.7853982 }
  0xbf   :  { %v197_v1 = vadd.s32 %v1622_v23, %v1630_v31  ;;  %v506_v2 = vmul.u32 %v1547_v52, %v452_v34  ;;  %vm508_vm8 = vc.u32 %v1678_v60, %v1680_v61  ;;  %v230_v7 = vsel %vm1686_vm7, 0, %v228_v62 }
  0xc0   :  { %v1378_v56 = vadd.s32 4294967294, %v209_v4  ;;  %v509_v5 = vadd.s32 1, %v505_v51  ;;  %v738_v6 = vsub.s32 32, %v737_v33  ;;  %v1697_v9 = vshrl.u32 %v735_v55, 5 }
  0xc1   :  { %v740_v17 = vshll.u32 %v1445_v41, %v737_v33  ;;  %v1700_v11 = vshll.u32 %v731_v3, 8  ;;  %v743_v52 = vshll.u32 %v1446_v43, %v737_v33  ;;  %v746_v14 = vshll.u32 %v1447_v45, %v737_v33 }
  0xc2   :  { %vm1379_vm9 = vcmp.lt.s32.totalorder %v1378_v56, 0  ;;  %v510_v63 = vsel %vm508_vm8, %v509_v5, %v505_v51  ;;  %v741_v23 = vshrl.u32 %v1446_v43, %v738_v6  ;;  %v744_v13 = vshrl.u32 %v1447_v45, %v738_v6 }
  0xc3   :  { %v212_v31 = vsel %vm1379_vm9, 0, %v1378_v56  ;;  %v511_v12 = vadd.s32 %v510_v63, %v506_v2  ;;  %v747_v20 = vshrl.u32 %v1448_v47, %v738_v6  ;;  %v749_v38 = vshll.u32 %v1448_v47, %v737_v33  ;;  %v89_v63 = vpop.f32.mrf.mxu3 }
  0xc4   :  { %v213_v18 = vsub.s32 32, %v212_v31  ;;  %v217_v8 = vsub.s32 4294967266, %v212_v31  ;;  %v214_v21 = vshll.u32 %v205_v44, %v212_v31  ;;  %v742_v25 = vor.u32 %v741_v23, %v740_v17 }
  0xc5   :  { %v512_v24 = vadd.s32 536870912, %v511_v12  ;;  %v750_v22 = vshrl.u32 %v1449_v49, %v738_v6  ;;  %v745_v35 = vor.u32 %v744_v13, %v743_v52  ;;  %v753_v40 = vshrl.u32 %v1450_v58, %v738_v6 }
  0xc6   :  { %v215_v26 = vshrl.u32 %v197_v1, %v213_v18  ;;  %v218_v32 = vadd.s32 127, %v217_v8  ;;  %v247_v42 = vadd.s32 3, %v230_v7  ;;  %v748_v36 = vor.u32 %v747_v20, %v746_v14 }
  0xc7   :  { %v513_v46 = vshrl.u32 %v512_v24, 30  ;;  %v751_v48 = vor.u32 %v750_v22, %v749_v38  ;;  %v752_v30 = vshll.u32 %v1449_v49, %v737_v33  ;;  %vm415_vm10 = vcmp.lt.s32.totalorder %v1522_v16, 0 }
  0xc8   :  { %v216_v50 = vor.u32 %v215_v26, %v214_v21  ;;  %v219_v53 = vshll.u32 %v218_v32, 23  ;;  %vm755_vm11 = vcmp.lt.s32.totalorder %v1697_v9, 1  ;;  %v772_v37 = vand.u32 65535, %v1700_v11 }
  0xc9   :  { %v514_v44 = vshll.u32 %v513_v46, 30  ;;  %v773_v27 = vshrl.u32 %v1700_v11, 16  ;;  %v754_v28 = vor.u32 %v753_v40, %v752_v30  ;;  %vm758_vm12 = vcmp.lt.s32.totalorder %v1697_v9, 4 }
  0xca   :  { %v220_v34 = vor.u32 4788187, %v219_v53  ;;  %v763_v54 = vsel %vm755_vm11, %v742_v25, %v745_v35  ;;  %v1718_v55 = vand.u32 3, %v247_v42  ;;  %vm757_vm13 = vcmp.lt.s32.totalorder %v1697_v9, 3 }
  0xcb   :  { %v1720_v57 = vsub.s32 %v511_v12, %v514_v44  ;;  %v764_v3 = vsel %vm758_vm12, %v751_v48, 920167782  ;;  %v223_v62 = vcvt.s32.f32 %v216_v50  ;;  %vm756_vm14 = vcmp.lt.s32.totalorder %v1697_v9, 2 }
  0xcc   :  { %v221_v4 = vand.u32 2147483647, %v220_v34  ;;  %v765_v51 = vsel %vm757_vm13, %v748_v36, %v764_v3  ;;  %v739_v1 = vshrl.u32 %v1445_v41, %v738_v6  ;;  %v537_v5 = vsub.s32 4, %v513_v46 }
  0xcd   :  { %vm516_vm15 = vcmp.lt.s32.totalorder %v1720_v57, 0  ;;  %v517_v33 = vsub.s32 0, %v1720_v57  ;;  %v766_v2 = vsel %vm756_vm14, %v763_v54, %v765_v51  ;;  %v767_v7 = vsel %vm755_vm11, %v745_v35, %v748_v36 }
  0xce   :  { %v224_v56 = vmul.f32 %v223_v62, %v221_v4  ;;  %v768_v17 = vsel %vm758_vm12, %v754_v28, 1326507024  ;;  %v760_v52 = vsel %vm758_vm12, %v748_v36, 2102212464  ;;  %v796_v31 = vand.u32 65535, %v766_v2 }
  0xcf   :  { %v518_v23 = vsel %vm516_vm15, %v517_v33, %v1720_v57  ;;  %v769_v6 = vsel %vm757_vm13, %v751_v48, %v768_v17  ;;  %v797_v18 = vshrl.u32 %v766_v2, 16  ;;  %v507_v8 = vadd.s32 %v1680_v61, %v1678_v60 }
  0xd0   :  { %v225_v12 = vxor.u32 2147483648, %v224_v56  ;;  %v519_v13 = vclz %v518_v23  ;;  %v770_v14 = vsel %vm756_vm14, %v767_v7, %v769_v6  ;;  %v1748_v20 = vsel %vm755_vm11, %v739_v1, %v742_v25 }
  0xd1   :  { %v774_v38 = vand.u32 65535, %v770_v14  ;;  %v1751_v21 = vadd.f32 %v1516_v10, %v89_v63  ;;  %v1757_v26 = vsel %vm415_vm10, %v537_v5, %v513_v46  ;;  %v775_v32 = vshrl.u32 %v770_v14, 16 }
  0xd2   :  { %v226_v24 = vsel %vm105_vm4, %v225_v12, %v224_v56  ;;  %v1384_v22 = vadd.s32 4294967294, %v519_v13  ;;  %v1766_v61 = vsel %vm757_vm13, %v745_v35, %v760_v52  ;;  %v798_v40 = vmul.u32 %v796_v31, %v772_v37 }
  0xd3   :  { %v1762_v60 = vsel %vm1686_vm7, %v1520_v15, %v226_v24  ;;  %v778_v25 = vmul.u32 %v774_v38, %v773_v27  ;;  %v777_v48 = vmul.u32 %v775_v32, %v772_v37  ;;  %v1770_v50 = vmul.u32 %v797_v18, %v772_v37 }
  0xd4   :  { %v231_v42 = vmul.f32 %v1762_v60, %v1762_v60  ;;  %vm1385_vm0 = vcmp.lt.s32.totalorder %v1384_v22, 0  ;;  %v776_v53 = vmul.u32 %v774_v38, %v772_v37  ;;  %v779_v36 = vmul.u32 %v775_v32, %v773_v27 }
  0xd5   :  { %v522_v46 = vsel %vm1385_vm0, 0, %v1384_v22  ;;  %v1772_v30 = vmul.u32 %v796_v31, %v773_v27  ;;  %v782_v28 = vshll.u32 %v778_v25, 16  ;;  %v780_v54 = vshll.u32 %v777_v48, 16 }
  0xd6   :  { %v232_v29 = vmul.f32 -0.001358992, %v231_v42  ;;  %v239_v44 = vmul.f32 -0.00019511016, %v231_v42  ;;  %v523_v34 = vsub.s32 32, %v522_v46  ;;  %v527_v35 = vsub.s32 4294967266, %v522_v46 }
  0xd7   :  { %v783_v3 = vshrl.u32 %v778_v25, 16  ;;  %v801_v4 = vmul.u32 %v797_v18, %v773_v27  ;;  %v524_v33 = vshll.u32 %v1720_v57, %v522_v46  ;;  %vm1777_vm1 = vcmp.le.f32.partialorder %v413_v19, 0.7853982 }
  0xd8   :  { %v233_v62 = vadd.f32 0.041655596, %v232_v29  ;;  %v240_v51 = vadd.f32 0.008332121, %v239_v44  ;;  %v525_v1 = vshrl.u32 %v507_v8, %v523_v34  ;;  %v528_v2 = vadd.s32 127, %v527_v35 }
  0xd9   :  { %vm784_vm2 = vc.u32 %v776_v53, %v780_v54  ;;  %v786_v56 = vadd.s32 %v780_v54, %v776_v53  ;;  %v802_v5 = vshll.u32 %v1770_v50, 16  ;;  %v781_v52 = vshrl.u32 %v777_v48, 16 }
  0xda   :  { %v234_v7 = vmul.f32 %v233_v62, %v231_v42  ;;  %v241_v17 = vmul.f32 %v240_v51, %v231_v42  ;;  %v526_v63 = vor.u32 %v525_v1, %v524_v33  ;;  %v785_v27 = vsel %vm784_vm2, 1, %v1451_v0 }
  0xdb   :  { %v529_v23 = vshll.u32 %v528_v2, 23  ;;  %v787_v57 = vadd.s32 %v785_v27, %v779_v36  ;;  %vm788_vm3 = vc.u32 %v786_v56, %v782_v28  ;;  %v804_v12 = vshll.u32 %v1772_v30, 16  ;;  %v74_v28 = vpop.f32.mrf.mxu0 }
  0xdc   :  { %v235_v6 = vadd.f32 -0.4999988, %v234_v7  ;;  %v242_v31 = vadd.f32 -0.16666654, %v241_v17  ;;  %v789_v19 = vsel %vm788_vm3, 1, %v1451_v0  ;;  %vm250_vm4 = vcmp.eq.s32.totalorder %v1718_v55, 0 }
  0xdd   :  { %v530_v13 = vor.u32 4788187, %v529_v23  ;;  %v791_v14 = vadd.s32 %v789_v19, %v787_v57  ;;  %vm806_vm5 = vc.u32 %v798_v40, %v802_v5  ;;  %v808_v18 = vadd.s32 %v802_v5, %v798_v40 }
  0xde   :  { %v236_v8 = vmul.f32 %v235_v6, %v231_v42  ;;  %v243_v38 = vmul.f32 %v242_v31, %v231_v42  ;;  %vm249_vm6 = vcmp.lt.s32.totalorder %v1718_v55, 2  ;;  %v533_v24 = vcvt.s32.f32 %v526_v63 }
  0xdf   :  { %v807_v22 = vsel %vm806_vm5, 1, %v1451_v0  ;;  %vm246_vm7 = vweird.f32 %v1520_v15  ;;  %v531_v32 = vand.u32 2147483647, %v530_v13  ;;  %v792_v25 = vadd.s32 %v791_v14, %v781_v52 }
  0xe0   :  { %v809_v48 = vadd.s32 %v807_v22, %v801_v4  ;;  %vm810_vm8 = vc.u32 %v808_v18, %v804_v12  ;;  %v237_v46 = vadd.f32 1.0, %v236_v8  ;;  %v244_v53 = vadd.f32 1.0, %v243_v38 }
  0xe1   :  { %v803_v36 = vshrl.u32 %v1770_v50, 16  ;;  %v811_v29 = vsel %vm810_vm8, 1, %v1451_v0  ;;  %v534_v40 = vmul.f32 %v533_v24, %v531_v32  ;;  %v1791_v44 = vadd.s32 %v792_v25, %v783_v3 }
  0xe2   :  { %v813_v42 = vadd.s32 %v811_v29, %v809_v48  ;;  %v1794_v34 = vmul.f32 30.0, %v1751_v21  ;;  %v245_v35 = vmul.f32 %v244_v53, %v1762_v60  ;;  %vm253_vm9 = vcmp.eq.s32.totalorder %v1718_v55, 2 }
  0xe3   :  { %v254_v54 = vxor.u32 2147483648, %v237_v46  ;;  %v540_v4 = vsel %vm1777_vm1, 0, %v1757_v26  ;;  %v535_v50 = vxor.u32 2147483648, %v534_v40  ;;  %v805_v62 = vshrl.u32 %v1772_v30, 16 }
  0xe4   :  { %v812_v51 = vadd.s32 %v808_v18, %v804_v12  ;;  %v814_v3 = vadd.s32 %v813_v42, %v803_v36  ;;  %v251_v33 = vxor.u32 2147483648, %v245_v35  ;;  %v762_v21 = vsel %vm756_vm14, %v1748_v20, %v1766_v61 }
  0xe5   :  { %v1033_v60 = vand.u32 2147483647, %v1794_v34  ;;  %v75_v1 = vadd.f32 %v1516_v10, %v74_v28  ;;  %v536_v2 = vsel %vm415_vm10, %v535_v50, %v534_v40  ;;  %v1036_v26 = vand.u32 2139095040, %v1794_v34 }
  0xe6   :  { %v815_v56 = vadd.s32 %v814_v3, %v805_v62  ;;  %vm818_vm11 = vc.u32 %v1791_v44, %v812_v51  ;;  %v252_v30 = vsel %vm250_vm4, %v237_v46, %v251_v33  ;;  %v255_v5 = vsel %vm253_vm9, %v254_v54, %v245_v35 }
  0xe7   :  { %v539_v9 = vsel %vm1777_vm1, %v1522_v16, %v536_v2  ;;  %v1040_v10 = vand.u32 8388607, %v1033_v60  ;;  %v256_v20 = vsel %vm249_vm6, %v252_v30, %v255_v5  ;;  %v1037_v17 = vshrl.u32 %v1036_v26, 23 }
  0xe8   :  { %v541_v61 = vmul.f32 %v539_v9, %v539_v9  ;;  %v819_v7 = vadd.s32 1, %v815_v56  ;;  %v257_v63 = vsel %vm246_vm7, nan, %v256_v20  ;;  %v557_v27 = vadd.s32 3, %v540_v4 }
  0xe9   :  { %v816_v23 = vmul.u32 %v1700_v11, %v762_v21  ;;  %1343 = vst [vmem:[#allocation2] sm:$0xff] %v257_v63  ;;  %v1395_v6 = vadd.s32 4294967169, %v1037_v17  ;;  %v1828_v19 = vmul.f32 30.0, %v75_v1  ;;  %v1041_v13 = vor.u32 8388608, %v1040_v10 }
  0xea   :  { %v542_v52 = vmul.f32 -0.001358992, %v541_v61  ;;  %v549_v57 = vmul.f32 -0.00019511016, %v541_v61  ;;  %v820_v37 = vsel %vm818_vm11, %v819_v7, %v815_v56  ;;  %v558_v38 = vand.u32 3, %v557_v27 }
  0xeb   :  { %v821_v31 = vadd.s32 %v820_v37, %v816_v23  ;;  %v1043_v14 = vadd.s32 1, %v1395_v6  ;;  %v261_v22 = vand.u32 2139095040, %v1828_v19  ;;  %v1831_v46 = vshll.u32 %v1041_v13, 8 }
  0xec   :  { %v543_v55 = vadd.f32 0.041655596, %v542_v52  ;;  %v550_v12 = vadd.f32 0.008332121, %v549_v57  ;;  %vm725_vm12 = vcmp.lt.s32.totalorder %v1539_v39, 0  ;;  %vm559_vm13 = vcmp.lt.s32.totalorder %v558_v38, 2 }
  0xed   :  { %v822_v18 = vadd.s32 536870912, %v821_v31  ;;  %vm1044_vm10 = vcmp.gt.s32.totalorder %v1043_v14, 0  ;;  %v258_v36 = vand.u32 2147483647, %v1828_v19  ;;  %vm560_vm14 = vcmp.eq.s32.totalorder %v558_v38, 0 }
  0xee   :  { %v544_v15 = vmul.f32 %v543_v55, %v541_v61  ;;  %v551_v8 = vmul.f32 %v550_v12, %v541_v61  ;;  %v1045_v24 = vsel %vm1044_vm10, %v1043_v14, 0  ;;  %vm556_vm15 = vweird.f32 %v1522_v16 }
  0xef   :  { %v823_v11 = vshrl.u32 %v822_v18, 30  ;;  %v1047_v48 = vand.u32 31, %v1045_v24  ;;  %vm563_vm0 = vcmp.eq.s32.totalorder %v558_v38, 2  ;;  %v817_v28 = vadd.s32 %v812_v51, %v1791_v44 }
  0xf0   :  { %v545_v32 = vadd.f32 -0.4999988, %v544_v15  ;;  %v552_v25 = vadd.f32 -0.16666654, %v551_v8  ;;  %v262_v54 = vshrl.u32 %v261_v22, 23  ;;  %v1838_v3 = vand.u32 65535, %v1831_v46 }
  0xf1   :  { %v824_v53 = vshll.u32 %v823_v11, 30  ;;  %v1048_v42 = vsub.s32 32, %v1047_v48  ;;  %v847_v62 = vsub.s32 4, %v823_v11  ;;  %v1843_v1 = vand.u32 8388607, %v258_v36 }
  0xf2   :  { %v546_v29 = vmul.f32 %v545_v32, %v541_v61  ;;  %v553_v40 = vmul.f32 %v552_v25, %v541_v61  ;;  %v1845_v26 = vshrl.u32 %v1045_v24, 5  ;;  %v1050_v30 = vshll.u32 %v1445_v41, %v1047_v48 }
  0xf3   :  { %v825_v35 = vsub.s32 %v821_v31, %v824_v53  ;;  %v1051_v21 = vshrl.u32 %v1446_v43, %v1048_v42  ;;  %v1057_v44 = vshrl.u32 %v1448_v47, %v1048_v42  ;;  %v1054_v5 = vshrl.u32 %v1447_v45, %v1048_v42 }
  0xf4   :  { %v547_v4 = vadd.f32 1.0, %v546_v29  ;;  %v554_v50 = vadd.f32 1.0, %v553_v40  ;;  %v1380_v10 = vadd.s32 4294967169, %v262_v54  ;;  %v1852_v7 = vsel %vm725_vm12, %v847_v62, %v823_v11 }
  0xf5   :  { %vm826_vm1 = vcmp.lt.s32.totalorder %v825_v35, 0  ;;  %v827_v33 = vsub.s32 0, %v825_v35  ;;  %v1056_v17 = vshll.u32 %v1447_v45, %v1047_v48  ;;  %v1052_v63 = vor.u32 %v1051_v21, %v1050_v30 }
  0xf6   :  { %v555_v2 = vmul.f32 %v554_v50, %v539_v9  ;;  %v564_v56 = vxor.u32 2147483648, %v547_v4  ;;  %v1053_v27 = vshll.u32 %v1446_v43, %v1047_v48  ;;  %v1059_v23 = vshll.u32 %v1448_v47, %v1047_v48 }
  0xf7   :  { %v828_v51 = vsel %vm826_vm1, %v827_v33, %v825_v35  ;;  %v1058_v37 = vor.u32 %v1057_v44, %v1056_v17  ;;  %v1060_v6 = vshrl.u32 %v1449_v49, %v1048_v42  ;;  %v1062_v12 = vshll.u32 %v1449_v49, %v1047_v48 }
  0xf8   :  { %v561_v20 = vxor.u32 2147483648, %v555_v2  ;;  %v829_v61 = vclz %v828_v51  ;;  %v565_v9 = vsel %vm563_vm0, %v564_v56, %v555_v2  ;;  %v1055_v55 = vor.u32 %v1054_v5, %v1053_v27 }
  0xf9   :  { %v1063_v13 = vshrl.u32 %v1450_v58, %v1048_v42  ;;  %vm1867_vm2 = vcmp.le.f32.partialorder %v723_v59, 0.7853982  ;;  %v1049_v15 = vshrl.u32 %v1445_v41, %v1048_v42  ;;  %v1061_v8 = vor.u32 %v1060_v6, %v1059_v23 }
  0xfa   :  { %v562_v52 = vsel %vm560_vm14, %v547_v4, %v561_v20  ;;  %v1390_v57 = vadd.s32 4294967294, %v829_v61  ;;  %vm1065_vm4 = vcmp.lt.s32.totalorder %v1845_v26, 1  ;;  %vm1068_vm5 = vcmp.lt.s32.totalorder %v1845_v26, 4 }
  0xfb   :  { %v566_v31 = vsel %vm559_vm13, %v562_v52, %v565_v9  ;;  %v1064_v11 = vor.u32 %v1063_v13, %v1062_v12  ;;  %vm1066_vm6 = vcmp.lt.s32.totalorder %v1845_v26, 2  ;;  %v1070_v59 = vsel %vm1068_vm5, %v1058_v37, 2102212464 }
  0xfc   :  { %v567_v14 = vsel %vm556_vm15, nan, %v566_v31  ;;  %vm1391_vm3 = vcmp.lt.s32.totalorder %v1390_v57, 0  ;;  %vm1067_vm7 = vcmp.lt.s32.totalorder %v1845_v26, 3  ;;  %v1073_v32 = vsel %vm1065_vm4, %v1052_v63, %v1055_v55 }
  0xfd   :  { %1345 = vst [vmem:[#allocation2 + $0x10] sm:$0xff] %v567_v14  ;;  %v832_v38 = vsel %vm1391_vm3, 0, %v1390_v57  ;;  %v1074_v25 = vsel %vm1068_vm5, %v1061_v8, 920167782  ;;  %v1077_v40 = vsel %vm1065_vm4, %v1055_v55, %v1058_v37  ;;  %v1069_v42 = vsel %vm1065_vm4, %v1049_v15, %v1052_v63 }
  0xfe   :  { %v833_v24 = vsub.s32 32, %v832_v38  ;;  %v837_v16 = vsub.s32 4294967266, %v832_v38  ;;  %v834_v22 = vshll.u32 %v825_v35, %v832_v38  ;;  %v1075_v29 = vsel %vm1067_vm7, %v1058_v37, %v1074_v25 }
  0xff   :  { %v1071_v54 = vsel %vm1067_vm7, %v1055_v55, %v1070_v59  ;;  %v1076_v4 = vsel %vm1066_vm6, %v1073_v32, %v1075_v29  ;;  %v1078_v50 = vsel %vm1068_vm5, %v1064_v11, 1326507024  ;;  %v268_v44 = vadd.s32 1, %v1380_v10 }
 0x100   :  { %v835_v48 = vshrl.u32 %v817_v28, %v833_v24  ;;  %v838_v53 = vadd.s32 127, %v837_v16  ;;  %v1079_v33 = vsel %vm1067_vm7, %v1061_v8, %v1078_v50  ;;  %v1106_v21 = vand.u32 65535, %v1076_v4 }
 0x101   :  { %v1080_v2 = vsel %vm1066_vm6, %v1077_v40, %v1079_v33  ;;  %v1083_v28 = vshrl.u32 %v1831_v46, 16  ;;  %v1107_v56 = vshrl.u32 %v1076_v4, 16  ;;  %v266_v20 = vor.u32 8388608, %v1843_v1 }
 0x102   :  { %v836_v62 = vor.u32 %v835_v48, %v834_v22  ;;  %v839_v35 = vshll.u32 %v838_v53, 23  ;;  %v1084_v30 = vand.u32 65535, %v1080_v2  ;;  %v1085_v5 = vshrl.u32 %v1080_v2, 16 }
 0x103   :  { %v850_v61 = vsel %vm1867_vm2, 0, %v1852_v7  ;;  %v1893_v17 = vsel %vm1066_vm6, %v1069_v42, %v1071_v54  ;;  %v1109_v9 = vmul.u32 %v1107_v56, %v1838_v3  ;;  %v1110_v63 = vmul.u32 %v1106_v21, %v1083_v28 }
 0x104   :  { %v840_v51 = vor.u32 4788187, %v839_v35  ;;  %v843_v23 = vcvt.s32.f32 %v836_v62  ;;  %v1087_v10 = vmul.u32 %v1085_v5, %v1838_v3  ;;  %v1088_v52 = vmul.u32 %v1084_v30, %v1083_v28 }
 0x105   :  { %v1108_v57 = vmul.u32 %v1106_v21, %v1838_v3  ;;  %v1111_v37 = vmul.u32 %v1107_v56, %v1083_v28  ;;  %v1112_v6 = vshll.u32 %v1109_v9, 16  ;;  %vm269_vm8 = vcmp.gt.s32.totalorder %v268_v44, 0 }
 0x106   :  { %v841_v27 = vand.u32 2147483647, %v840_v51  ;;  %v1086_v7 = vmul.u32 %v1084_v30, %v1838_v3  ;;  %v1089_v55 = vmul.u32 %v1085_v5, %v1083_v28  ;;  %v1090_v26 = vshll.u32 %v1087_v10, 16 }
 0x107   :  { %v1092_v12 = vshll.u32 %v1088_v52, 16  ;;  %v1114_v13 = vshll.u32 %v1110_v63, 16  ;;  %vm1116_vm9 = vc.u32 %v1108_v57, %v1112_v6  ;;  %v1118_v14 = vadd.s32 %v1112_v6, %v1108_v57 }
 0x108   :  { %v844_v31 = vmul.f32 %v843_v23, %v841_v27  ;;  %vm1094_vm11 = vc.u32 %v1086_v7, %v1090_v26  ;;  %v1096_v8 = vadd.s32 %v1090_v26, %v1086_v7  ;;  %v1117_v38 = vsel %vm1116_vm9, 1, %v1451_v0 }
 0x109   :  { %v1095_v11 = vsel %vm1094_vm11, 1, %v1451_v0  ;;  %v1113_v24 = vshrl.u32 %v1109_v9, 16  ;;  %v1119_v16 = vadd.s32 %v1117_v38, %v1111_v37  ;;  %vm1120_vm10 = vc.u32 %v1118_v14, %v1114_v13 }
 0x10a   :  { %v845_v15 = vxor.u32 2147483648, %v844_v31  ;;  %v1097_v3 = vadd.s32 %v1095_v11, %v1089_v55  ;;  %vm1098_vm13 = vc.u32 %v1096_v8, %v1092_v12  ;;  %v1121_v22 = vsel %vm1120_vm10, 1, %v1451_v0 }
 0x10b   :  { %v1099_v25 = vsel %vm1098_vm13, 1, %v1451_v0  ;;  %v1123_v48 = vadd.s32 %v1121_v22, %v1119_v16  ;;  %v270_v53 = vsel %vm269_vm8, %v268_v44, 0  ;;  %v1091_v40 = vshrl.u32 %v1087_v10, 16 }
 0x10c   :  { %v846_v59 = vsel %vm725_vm12, %v845_v15, %v844_v31  ;;  %v1101_v42 = vadd.s32 %v1099_v25, %v1097_v3  ;;  %v272_v54 = vand.u32 31, %v270_v53  ;;  %v867_v4 = vadd.s32 3, %v850_v61 }
 0x10d   :  { %v849_v32 = vsel %vm1867_vm2, %v1539_v39, %v846_v59  ;;  %v1093_v50 = vshrl.u32 %v1088_v52, 16  ;;  %v1115_v62 = vshrl.u32 %v1110_v63, 16  ;;  %v1124_v35 = vadd.s32 %v1123_v48, %v1113_v24 }
 0x10e   :  { %v851_v29 = vmul.f32 %v849_v32, %v849_v32  ;;  %v1102_v2 = vadd.s32 %v1101_v42, %v1091_v40  ;;  %v273_v28 = vsub.s32 32, %v272_v54  ;;  %v1909_v56 = vadd.s32 %v1118_v14, %v1114_v13 }
 0x10f   :  { %v1125_v18 = vadd.s32 %v1124_v35, %v1115_v62  ;;  %v1126_v51 = vmul.u32 %v1831_v46, %v1893_v17  ;;  %v275_v44 = vshll.u32 %v1445_v41, %v272_v54  ;;  %v278_v61 = vshll.u32 %v1446_v43, %v272_v54 }
 0x110   :  { %v852_v33 = vmul.f32 -0.001358992, %v851_v29  ;;  %v859_v21 = vmul.f32 -0.00019511016, %v851_v29  ;;  %v1914_v9 = vadd.s32 %v1102_v2, %v1093_v50  ;;  %v276_v27 = vshrl.u32 %v1446_v43, %v273_v28 }
 0x111   :  { %v1129_v63 = vadd.s32 1, %v1125_v18  ;;  %v279_v23 = vshrl.u32 %v1447_v45, %v273_v28  ;;  %v281_v10 = vshll.u32 %v1447_v45, %v272_v54  ;;  %v282_v46 = vshrl.u32 %v1448_v47, %v273_v28 }
 0x112   :  { %v853_v30 = vadd.f32 0.041655596, %v852_v33  ;;  %v860_v5 = vadd.f32 0.008332121, %v859_v21  ;;  %vm1128_vm12 = vc.u32 %v1914_v9, %v1909_v56  ;;  %v868_v17 = vand.u32 3, %v867_v4 }
 0x113   :  { %v1130_v37 = vsel %vm1128_vm12, %v1129_v63, %v1125_v18  ;;  %v1923_v6 = vshrl.u32 %v270_v53, 5  ;;  %v277_v31 = vor.u32 %v276_v27, %v275_v44  ;;  %v284_v12 = vshll.u32 %v1448_v47, %v272_v54 }
 0x114   :  { %v854_v52 = vmul.f32 %v853_v30, %v851_v29  ;;  %v861_v57 = vmul.f32 %v860_v5, %v851_v29  ;;  %v1131_v26 = vadd.s32 %v1130_v37, %v1126_v51  ;;  %v1926_v13 = vor.u32 %v279_v23, %v278_v61 }
 0x115   :  { %v285_v14 = vshrl.u32 %v1449_v49, %v273_v28  ;;  %v287_v15 = vshll.u32 %v1449_v49, %v272_v54  ;;  %v288_v8 = vshrl.u32 %v1450_v58, %v273_v28  ;;  %v283_v16 = vor.u32 %v282_v46, %v281_v10 }
 0x116   :  { %v855_v7 = vadd.f32 -0.4999988, %v854_v52  ;;  %v862_v55 = vadd.f32 -0.16666654, %v861_v57  ;;  %v1132_v24 = vadd.s32 536870912, %v1131_v26  ;;  %vm290_vm14 = vcmp.lt.s32.totalorder %v1923_v6, 1 }
 0x117   :  { %v286_v59 = vor.u32 %v285_v14, %v284_v12  ;;  %v289_v3 = vor.u32 %v288_v8, %v287_v15  ;;  %vm293_vm15 = vcmp.lt.s32.totalorder %v1923_v6, 4  ;;  %vm292_vm0 = vcmp.lt.s32.totalorder %v1923_v6, 3 }
 0x118   :  { %v856_v38 = vmul.f32 %v855_v7, %v851_v29  ;;  %v863_v11 = vmul.f32 %v862_v55, %v851_v29  ;;  %v1933_v48 = vshrl.u32 %v1132_v24, 30  ;;  %vm866_vm1 = vweird.f32 %v1539_v39 }
 0x119   :  { %vm869_vm2 = vcmp.lt.s32.totalorder %v868_v17, 2  ;;  %v299_v53 = vsel %vm293_vm15, %v286_v59, 920167782  ;;  %v298_v54 = vsel %vm290_vm14, %v277_v31, %v1926_v13  ;;  %vm870_vm3 = vcmp.eq.s32.totalorder %v868_v17, 0 }
 0x11a   :  { %v857_v22 = vadd.f32 1.0, %v856_v38  ;;  %v864_v25 = vadd.f32 1.0, %v863_v11  ;;  %v1134_v42 = vshll.u32 %v1933_v48, 30  ;;  %v300_v4 = vsel %vm292_vm0, %v283_v16, %v299_v53  ;;  %v1977_v11 = vld [vmem:[%s2318_s2] ss:$0 sm:$0xff]  ;;  %s1452_s2 = smov [#allocation2]  }
 0x11b   :  { %v303_v50 = vsel %vm293_vm15, %v289_v3, 1326507024  ;;  %v1949_v62 = vshll.u32 %v266_v20, 8  ;;  %vm291_vm4 = vcmp.lt.s32.totalorder %v1923_v6, 2  ;;  %v302_v33 = vsel %vm290_vm14, %v1926_v13, %v283_v16  ;;  %s1355_s7 = sshll.u32 %s1452_s2, 4  ;;  %s1356_s7 = int_to_ptr.vmem [resolvable:$true] %s1355_s7 }
 0x11c   :  { %v865_v29 = vmul.f32 %v864_v25, %v849_v32  ;;  %v874_v40 = vxor.u32 2147483648, %v857_v22  ;;  %v1135_v32 = vsub.s32 %v1131_v26, %v1134_v42  ;;  %vm873_vm5 = vcmp.eq.s32.totalorder %v868_v17, 2  ;;  %v80_v17 = vpop.f32.mrf.mxu1 }
 0x11d   :  { %v274_v21 = vshrl.u32 %v1445_v41, %v273_v28  ;;  %v301_v2 = vsel %vm291_vm4, %v298_v54, %v300_v4  ;;  %v304_v18 = vsel %vm292_vm0, %v286_v59, %v303_v50  ;;  %v307_v5 = vand.u32 65535, %v1949_v62 }
 0x11e   :  { %v871_v35 = vxor.u32 2147483648, %v865_v29  ;;  %v875_v20 = vsel %vm873_vm5, %v874_v40, %v865_v29  ;;  %vm1136_vm6 = vcmp.lt.s32.totalorder %v1135_v32, 0  ;;  %v1137_v51 = vsub.s32 0, %v1135_v32 }
 0x11f   :  { %v305_v30 = vsel %vm291_vm4, %v302_v33, %v304_v18  ;;  %v332_v61 = vshrl.u32 %v301_v2, 16  ;;  %v331_v23 = vand.u32 65535, %v301_v2  ;;  %v308_v52 = vshrl.u32 %v1949_v62, 16 }
 0x120   :  { %v872_v1 = vsel %vm870_vm3, %v857_v22, %v871_v35  ;;  %v1138_v63 = vsel %vm1136_vm6, %v1137_v51, %v1135_v32  ;;  %v309_v27 = vand.u32 65535, %v305_v30  ;;  %v310_v57 = vshrl.u32 %v305_v30, 16  ;;  %v86_v51 = vpop.f32.mrf.mxu2 }
 0x121   :  { %v876_v44 = vsel %vm869_vm2, %v872_v1, %v875_v20  ;;  %v1139_v10 = vclz %v1138_v63  ;;  %v334_v46 = vmul.u32 %v332_v61, %v307_v5  ;;  %v1127_v37 = vadd.s32 %v1909_v56, %v1914_v9 }
 0x122   :  { %v877_v28 = vsel %vm866_vm1, nan, %v876_v44  ;;  %v294_v7 = vsel %vm290_vm14, %v274_v21, %v277_v31  ;;  %v295_v39 = vsel %vm293_vm15, %v283_v16, 2102212464  ;;  %v1157_v26 = vsub.s32 4, %v1933_v48 }
 0x123   :  { %1347 = vst [vmem:[#allocation2 + $0x20] sm:$0xff] %v877_v28  ;;  %v1396_v55 = vadd.s32 4294967294, %v1139_v10  ;;  %v312_v12 = vmul.u32 %v310_v57, %v307_v5  ;;  %v313_v14 = vmul.u32 %v309_v27, %v308_v52  ;;  %v333_v15 = vmul.u32 %v331_v23, %v307_v5 }
 0x124   :  { %v335_v8 = vmul.u32 %v331_v23, %v308_v52  ;;  %v337_v38 = vshll.u32 %v334_v46, 16  ;;  %v81_v56 = vadd.f32 %v1977_v11, %v80_v17  ;;  %v311_v9 = vmul.u32 %v309_v27, %v307_v5 }
 0x125   :  { %vm1397_vm7 = vcmp.lt.s32.totalorder %v1396_v55, 0  ;;  %v314_v31 = vmul.u32 %v310_v57, %v308_v52  ;;  %v315_v24 = vshll.u32 %v312_v12, 16  ;;  %v317_v59 = vshll.u32 %v313_v14, 16 }
 0x126   :  { %v1142_v16 = vsel %vm1397_vm7, 0, %v1396_v55  ;;  %v336_v3 = vmul.u32 %v332_v61, %v308_v52  ;;  %v339_v22 = vshll.u32 %v335_v8, 16  ;;  %vm341_vm9 = vc.u32 %v333_v15, %v337_v38 }
 0x127   :  { %v1143_v25 = vsub.s32 32, %v1142_v16  ;;  %v1144_v53 = vshll.u32 %v1135_v32, %v1142_v16  ;;  %v1147_v29 = vsub.s32 4294967266, %v1142_v16  ;;  %vm319_vm8 = vc.u32 %v311_v9, %v315_v24 }
 0x128   :  { %v320_v40 = vsel %vm319_vm8, 1, %v1451_v0  ;;  %v321_v42 = vadd.s32 %v315_v24, %v311_v9  ;;  %v343_v54 = vadd.s32 %v337_v38, %v333_v15  ;;  %v342_v33 = vsel %vm341_vm9, 1, %v1451_v0 }
 0x129   :  { %v1145_v4 = vshrl.u32 %v1127_v37, %v1143_v25  ;;  %v1148_v50 = vadd.s32 127, %v1147_v29  ;;  %v322_v35 = vadd.s32 %v320_v40, %v314_v31  ;;  %v338_v21 = vshrl.u32 %v334_v46, 16 }
 0x12a   :  { %vm323_vm11 = vc.u32 %v321_v42, %v317_v59  ;;  %v344_v2 = vadd.s32 %v342_v33, %v336_v3  ;;  %vm345_vm10 = vc.u32 %v343_v54, %v339_v22  ;;  %v316_v44 = vshrl.u32 %v312_v12, 16 }
 0x12b   :  { %v1146_v18 = vor.u32 %v1145_v4, %v1144_v53  ;;  %v1149_v1 = vshll.u32 %v1148_v50, 23  ;;  %v324_v32 = vsel %vm323_vm11, 1, %v1451_v0  ;;  %v346_v20 = vsel %vm345_vm10, 1, %v1451_v0 }
 0x12c   :  { %v326_v30 = vadd.s32 %v324_v32, %v322_v35  ;;  %v348_v5 = vadd.s32 %v346_v20, %v344_v2  ;;  %v1984_v61 = vmul.f32 30.0, %v81_v56  ;;  %v296_v63 = vsel %vm292_vm0, %v1926_v13, %v295_v39 }
 0x12d   :  { %v1150_v28 = vor.u32 4788187, %v1149_v1  ;;  %v318_v27 = vshrl.u32 %v313_v14, 16  ;;  %v340_v23 = vshrl.u32 %v335_v8, 16  ;;  %v87_v46 = vadd.f32 %v1977_v11, %v86_v51 }
 0x12e   :  { %v327_v10 = vadd.s32 %v326_v30, %v316_v44  ;;  %v349_v52 = vadd.s32 %v348_v5, %v338_v21  ;;  %v568_v57 = vand.u32 2147483647, %v1984_v61  ;;  %vm1035_vm13 = vcmp.lt.s32.totalorder %v1794_v34, 0 }
 0x12f   :  { %v1151_v17 = vand.u32 2147483647, %v1150_v28  ;;  %v1153_v37 = vcvt.s32.f32 %v1146_v18  ;;  %v571_v55 = vand.u32 2139095040, %v1984_v61  ;;  %v297_v12 = vsel %vm291_vm4, %v294_v7, %v296_v63 }
 0x130   :  { %v328_v15 = vadd.s32 %v327_v10, %v318_v27  ;;  %v347_v38 = vadd.s32 %v343_v54, %v339_v22  ;;  %v350_v13 = vadd.s32 %v349_v52, %v340_v23  ;;  %v1158_v14 = vsel %vm1035_vm13, %v1157_v26, %v1933_v48 }
 0x131   :  { %v1154_v39 = vmul.f32 %v1153_v37, %v1151_v17  ;;  %v572_v8 = vshrl.u32 %v571_v55, 23  ;;  %v575_v56 = vand.u32 8388607, %v568_v57  ;;  %v2000_v31 = vmul.f32 30.0, %v87_v46 }
 0x132   :  { %vm353_vm12 = vc.u32 %v328_v15, %v347_v38  ;;  %v354_v9 = vadd.s32 1, %v350_v13  ;;  %vm1034_vm14 = vcmp.le.f32.partialorder %v1033_v60, 0.7853982  ;;  %v351_v7 = vmul.u32 %v1949_v62, %v297_v12 }
 0x133   :  { %v1155_v6 = vxor.u32 2147483648, %v1154_v39  ;;  %v1386_v24 = vadd.s32 4294967169, %v572_v8  ;;  %v1160_v16 = vsel %vm1034_vm14, 0, %v1158_v14  ;;  %v576_v3 = vor.u32 8388608, %v575_v56 }
 0x134   :  { %v355_v59 = vsel %vm353_vm12, %v354_v9, %v350_v13  ;;  %v881_v53 = vand.u32 2139095040, %v2000_v31  ;;  %v1177_v40 = vadd.s32 3, %v1160_v16  ;;  %v878_v62 = vand.u32 2147483647, %v2000_v31 }
 0x135   :  { %v1156_v48 = vsel %vm1035_vm13, %v1155_v6, %v1154_v39  ;;  %v356_v26 = vadd.s32 %v355_v59, %v351_v7  ;;  %v578_v22 = vadd.s32 1, %v1386_v24  ;;  %v2010_v35 = vshll.u32 %v576_v3, 8 }
 0x136   :  { %v1159_v25 = vsel %vm1034_vm14, %v1794_v34, %v1156_v48  ;;  %vm260_vm0 = vcmp.lt.s32.totalorder %v1828_v19, 0  ;;  %v882_v21 = vshrl.u32 %v881_v53, 23  ;;  %v2013_v1 = vand.u32 3, %v1177_v40 }
 0x137   :  { %v1161_v29 = vmul.f32 %v1159_v25, %v1159_v25  ;;  %v357_v42 = vadd.s32 536870912, %v356_v26  ;;  %vm579_vm15 = vcmp.gt.s32.totalorder %v578_v22, 0  ;;  %vm2017_vm1 = vcmp.le.f32.partialorder %v258_v36, 0.7853982 }
 0x138   :  { %v580_v60 = vsel %vm579_vm15, %v578_v22, 0  ;;  %v352_v51 = vadd.s32 %v347_v38, %v328_v15  ;;  %v2023_v5 = vand.u32 8388607, %v878_v62  ;;  %v2028_v23 = vand.u32 65535, %v2010_v35 }
 0x139   :  { %v1162_v54 = vmul.f32 -0.001358992, %v1161_v29  ;;  %v1169_v4 = vmul.f32 -0.00019511016, %v1161_v29  ;;  %v358_v50 = vshrl.u32 %v357_v42, 30  ;;  %v582_v33 = vand.u32 31, %v580_v60 }
 0x13a   :  { %v2030_v10 = vshrl.u32 %v580_v60, 5  ;;  %v2034_v52 = vshrl.u32 %v2010_v35, 16  ;;  %v1392_v46 = vadd.s32 4294967169, %v882_v21  ;;  %vm1180_vm3 = vcmp.eq.s32.totalorder %v2013_v1, 0 }
 0x13b   :  { %v1163_v2 = vadd.f32 0.041655596, %v1162_v54  ;;  %v1170_v18 = vadd.f32 0.008332121, %v1169_v4  ;;  %v359_v20 = vshll.u32 %v358_v50, 30  ;;  %v382_v44 = vsub.s32 4, %v358_v50 }
 0x13c   :  { %v583_v30 = vsub.s32 32, %v582_v33  ;;  %v585_v36 = vshll.u32 %v1445_v41, %v582_v33  ;;  %vm1183_vm4 = vcmp.eq.s32.totalorder %v2013_v1, 2  ;;  %v588_v38 = vshll.u32 %v1446_v43, %v582_v33 }
 0x13d   :  { %v1164_v28 = vmul.f32 %v1163_v2, %v1161_v29  ;;  %v1171_v63 = vmul.f32 %v1170_v18, %v1161_v29  ;;  %v2025_v27 = vsub.s32 %v356_v26, %v359_v20  ;;  %v383_v12 = vsel %vm260_vm0, %v382_v44, %v358_v50 }
 0x13e   :  { %v586_v15 = vshrl.u32 %v1446_v43, %v583_v30  ;;  %v589_v13 = vshrl.u32 %v1447_v45, %v583_v30  ;;  %vm1179_vm5 = vcmp.lt.s32.totalorder %v2013_v1, 2  ;;  %v594_v56 = vshll.u32 %v1448_v47, %v582_v33 }
 0x13f   :  { %v1165_v17 = vadd.f32 -0.4999988, %v1164_v28  ;;  %v1172_v37 = vadd.f32 -0.16666654, %v1171_v63  ;;  %vm361_vm2 = vcmp.lt.s32.totalorder %v2025_v27, 0  ;;  %v362_v55 = vsub.s32 0, %v2025_v27 }
 0x140   :  { %vm1176_vm6 = vweird.f32 %v1794_v34  ;;  %v591_v6 = vshll.u32 %v1447_v45, %v582_v33  ;;  %v592_v7 = vshrl.u32 %v1448_v47, %v583_v30  ;;  %v595_v24 = vshrl.u32 %v1449_v49, %v583_v30 }
 0x141   :  { %v1166_v39 = vmul.f32 %v1165_v17, %v1161_v29  ;;  %v1173_v14 = vmul.f32 %v1172_v37, %v1161_v29  ;;  %v363_v8 = vsel %vm361_vm2, %v362_v55, %v2025_v27  ;;  %v597_v48 = vshll.u32 %v1449_v49, %v582_v33 }
 0x142   :  { %v364_v9 = vclz %v363_v8  ;;  %v598_v26 = vshrl.u32 %v1450_v58, %v583_v30  ;;  %v385_v22 = vsel %vm2017_vm1, 0, %v383_v12  ;;  %v587_v53 = vor.u32 %v586_v15, %v585_v36 }
 0x143   :  { %v1167_v16 = vadd.f32 1.0, %v1166_v39  ;;  %v1174_v59 = vadd.f32 1.0, %v1173_v14  ;;  %v888_v29 = vadd.s32 1, %v1392_v46  ;;  %v590_v60 = vor.u32 %v589_v13, %v588_v38 }
 0x144   :  { %v1381_v3 = vadd.s32 4294967294, %v364_v9  ;;  %v596_v54 = vor.u32 %v595_v24, %v594_v56  ;;  %v584_v4 = vshrl.u32 %v1445_v41, %v583_v30  ;;  %v593_v50 = vor.u32 %v592_v7, %v591_v6 }
 0x145   :  { %v1175_v40 = vmul.f32 %v1174_v59, %v1159_v25  ;;  %v1184_v42 = vxor.u32 2147483648, %v1167_v16  ;;  %vm600_vm8 = vcmp.lt.s32.totalorder %v2030_v10, 1  ;;  %v599_v2 = vor.u32 %v598_v26, %v597_v48 }
 0x146   :  { %vm1382_vm7 = vcmp.lt.s32.totalorder %v1381_v3, 0  ;;  %vm603_vm9 = vcmp.lt.s32.totalorder %v2030_v10, 4  ;;  %vm601_vm11 = vcmp.lt.s32.totalorder %v2030_v10, 2  ;;  %vm602_vm10 = vcmp.lt.s32.totalorder %v2030_v10, 3 }
 0x147   :  { %v1181_v21 = vxor.u32 2147483648, %v1175_v40  ;;  %v367_v33 = vsel %vm1382_vm7, 0, %v1381_v3  ;;  %v1185_v44 = vsel %vm1183_vm4, %v1184_v42, %v1175_v40  ;;  %v608_v30 = vsel %vm600_vm8, %v587_v53, %v590_v60 }
 0x148   :  { %v368_v18 = vsub.s32 32, %v367_v33  ;;  %v372_v20 = vsub.s32 4294967266, %v367_v33  ;;  %v609_v28 = vsel %vm603_vm9, %v596_v54, 920167782  ;;  %v369_v36 = vshll.u32 %v2025_v27, %v367_v33 }
 0x149   :  { %v1182_v25 = vsel %vm1180_vm3, %v1167_v16, %v1181_v21  ;;  %v605_v55 = vsel %vm603_vm9, %v593_v50, 2102212464  ;;  %v610_v12 = vsel %vm602_vm10, %v593_v50, %v609_v28  ;;  %v612_v15 = vsel %vm600_vm8, %v590_v60, %v593_v50 }
 0x14a   :  { %v1186_v63 = vsel %vm1179_vm5, %v1182_v25, %v1185_v44  ;;  %v370_v46 = vshrl.u32 %v352_v51, %v368_v18  ;;  %v373_v17 = vadd.s32 127, %v372_v20  ;;  %v611_v27 = vsel %vm601_vm11, %v608_v30, %v610_v12 }
 0x14b   :  { %v1187_v37 = vsel %vm1176_vm6, nan, %v1186_v63  ;;  %v613_v51 = vsel %vm603_vm9, %v599_v2, 1326507024  ;;  %v402_v34 = vadd.s32 3, %v385_v22  ;;  %v641_v39 = vand.u32 65535, %v611_v27 }
 0x14c   :  { %1349 = vst [vmem:[#allocation2 + $0x30] sm:$0xff] %v1187_v37  ;;  %v371_v38 = vor.u32 %v370_v46, %v369_v36  ;;  %v374_v1 = vshll.u32 %v373_v17, 23  ;;  %v614_v13 = vsel %vm602_vm10, %v596_v54, %v613_v51  ;;  %v642_v14 = vshrl.u32 %v611_v27, 16 }
 0x14d   :  { %v604_v56 = vsel %vm600_vm8, %v584_v4, %v587_v53  ;;  %v606_v9 = vsel %vm602_vm10, %v590_v60, %v605_v55  ;;  %v615_v6 = vsel %vm601_vm11, %v612_v15, %v614_v13  ;;  %v886_v59 = vor.u32 8388608, %v2023_v5 }
 0x14e   :  { %v375_v8 = vor.u32 4788187, %v374_v1  ;;  %v619_v7 = vand.u32 65535, %v615_v6  ;;  %v620_v24 = vshrl.u32 %v615_v6, 16  ;;  %v644_v16 = vmul.u32 %v642_v14, %v2028_v23 }
 0x14f   :  { %v378_v26 = vcvt.s32.f32 %v371_v38  ;;  %v645_v3 = vmul.u32 %v641_v39, %v2034_v52  ;;  %vm889_vm13 = vcmp.gt.s32.totalorder %v888_v29, 0  ;;  %v2095_v22 = vand.u32 3, %v402_v34 }
 0x150   :  { %v376_v48 = vand.u32 2147483647, %v375_v8  ;;  %v2099_v53 = vsel %vm601_vm11, %v604_v56, %v606_v9  ;;  %v622_v40 = vmul.u32 %v620_v24, %v2028_v23  ;;  %v623_v42 = vmul.u32 %v619_v7, %v2034_v52 }
 0x151   :  { %v643_v54 = vmul.u32 %v641_v39, %v2028_v23  ;;  %v646_v4 = vmul.u32 %v642_v14, %v2034_v52  ;;  %v647_v50 = vshll.u32 %v644_v16, 16  ;;  %v621_v21 = vmul.u32 %v619_v7, %v2028_v23 }
 0x152   :  { %v379_v60 = vmul.f32 %v378_v26, %v376_v48  ;;  %v624_v33 = vmul.u32 %v620_v24, %v2034_v52  ;;  %v625_v2 = vshll.u32 %v622_v40, 16  ;;  %v890_v18 = vsel %vm889_vm13, %v888_v29, 0 }
 0x153   :  { %v649_v10 = vshll.u32 %v645_v3, 16  ;;  %vm651_vm12 = vc.u32 %v643_v54, %v647_v50  ;;  %v653_v25 = vadd.s32 %v647_v50, %v643_v54  ;;  %v627_v44 = vshll.u32 %v623_v42, 16 }
 0x154   :  { %v380_v20 = vxor.u32 2147483648, %v379_v60  ;;  %vm629_vm14 = vc.u32 %v621_v21, %v625_v2  ;;  %v631_v30 = vadd.s32 %v625_v2, %v621_v21  ;;  %v652_v28 = vsel %vm651_vm12, 1, %v1451_v0 }
 0x155   :  { %v630_v36 = vsel %vm629_vm14, 1, %v1451_v0  ;;  %v654_v46 = vadd.s32 %v652_v28, %v646_v4  ;;  %vm655_vm15 = vc.u32 %v653_v25, %v649_v10  ;;  %v648_v55 = vshrl.u32 %v644_v16, 16 }
 0x156   :  { %v381_v63 = vsel %vm260_vm0, %v380_v20, %v379_v60  ;;  %v632_v52 = vadd.s32 %v630_v36, %v624_v33  ;;  %vm633_vm2 = vc.u32 %v631_v30, %v627_v44  ;;  %v656_v29 = vsel %vm655_vm15, 1, %v1451_v0 }
 0x157   :  { %v384_v23 = vsel %vm2017_vm1, %v1828_v19, %v381_v63  ;;  %v634_v37 = vsel %vm633_vm2, 1, %v1451_v0  ;;  %v658_v12 = vadd.s32 %v656_v29, %v654_v46  ;;  %v626_v15 = vshrl.u32 %v622_v40, 16 }
 0x158   :  { %v386_v17 = vmul.f32 %v384_v23, %v384_v23  ;;  %v636_v38 = vadd.s32 %v634_v37, %v632_v52  ;;  %v661_v1 = vmul.u32 %v2010_v35, %v2099_v53  ;;  %v892_v27 = vand.u32 31, %v890_v18 }
 0x159   :  { %v650_v13 = vshrl.u32 %v645_v3, 16  ;;  %v659_v32 = vadd.s32 %v658_v12, %v648_v55  ;;  %v628_v39 = vshrl.u32 %v623_v42, 16  ;;  %v2118_v8 = vadd.s32 %v653_v25, %v649_v10 }
 0x15a   :  { %v387_v51 = vmul.f32 -0.001358992, %v386_v17  ;;  %v394_v34 = vmul.f32 -0.00019511016, %v386_v17  ;;  %v637_v14 = vadd.s32 %v636_v38, %v626_v15  ;;  %v2120_v56 = vsub.s32 32, %v892_v27 }
 0x15b   :  { %v660_v7 = vadd.s32 %v659_v32, %v650_v13  ;;  %v895_v24 = vshll.u32 %v1445_v41, %v892_v27  ;;  %v898_v48 = vshll.u32 %v1446_v43, %v892_v27  ;;  %v2134_v60 = vshrl.u32 %v890_v18, 5 }
 0x15c   :  { %v388_v9 = vadd.f32 0.041655596, %v387_v51  ;;  %v395_v6 = vadd.f32 0.008332121, %v394_v34  ;;  %v2123_v16 = vadd.s32 %v637_v14, %v628_v39  ;;  %v896_v35 = vshrl.u32 %v1446_v43, %v2120_v56 }
 0x15d   :  { %v899_v26 = vshrl.u32 %v1447_v45, %v2120_v56  ;;  %v664_v40 = vadd.s32 1, %v660_v7  ;;  %v902_v42 = vshrl.u32 %v1448_v47, %v2120_v56  ;;  %v901_v4 = vshll.u32 %v1447_v45, %v892_v27 }
 0x15e   :  { %v389_v3 = vmul.f32 %v388_v9, %v386_v17  ;;  %v396_v53 = vmul.f32 %v395_v6, %v386_v17  ;;  %vm663_vm0 = vc.u32 %v2123_v16, %v2118_v8  ;;  %v2136_v54 = vor.u32 %v896_v35, %v895_v24 }
 0x15f   :  { %v665_v33 = vsel %vm663_vm0, %v664_v40, %v660_v7  ;;  %v2139_v2 = vor.u32 %v899_v26, %v898_v48  ;;  %v903_v10 = vor.u32 %v902_v42, %v901_v4  ;;  %v904_v25 = vshll.u32 %v1448_v47, %v892_v27 }
 0x160   :  { %v390_v50 = vadd.f32 -0.4999988, %v389_v3  ;;  %v397_v21 = vadd.f32 -0.16666654, %v396_v53  ;;  %v666_v20 = vadd.s32 %v665_v33, %v661_v1  ;;  %v905_v44 = vshrl.u32 %v1449_v49, %v2120_v56 }
 0x161   :  { %v907_v18 = vshll.u32 %v1449_v49, %v892_v27  ;;  %v908_v63 = vshrl.u32 %v1450_v58, %v2120_v56  ;;  %vm910_vm1 = vcmp.lt.s32.totalorder %v2134_v60, 1  ;;  %vm911_vm3 = vcmp.lt.s32.totalorder %v2134_v60, 2 }
 0x162   :  { %v391_v30 = vmul.f32 %v390_v50, %v386_v17  ;;  %v398_v28 = vmul.f32 %v397_v21, %v386_v17  ;;  %v667_v36 = vadd.s32 536870912, %v666_v20  ;;  %v906_v46 = vor.u32 %v905_v44, %v904_v25 }
 0x163   :  { %v909_v37 = vor.u32 %v908_v63, %v907_v18  ;;  %vm913_vm4 = vcmp.lt.s32.totalorder %v2134_v60, 4  ;;  %vm912_vm5 = vcmp.lt.s32.totalorder %v2134_v60, 3  ;;  %v918_v17 = vsel %vm910_vm1, %v2136_v54, %v2139_v2 }
 0x164   :  { %v392_v52 = vadd.f32 1.0, %v391_v30  ;;  %v399_v29 = vadd.f32 1.0, %v398_v28  ;;  %v2150_v55 = vshrl.u32 %v667_v36, 30  ;;  %v919_v12 = vsel %vm913_vm4, %v906_v46, 920167782 }
 0x165   :  { %v920_v1 = vsel %vm912_vm5, %v903_v10, %v919_v12  ;;  %v922_v27 = vsel %vm910_vm1, %v2139_v2, %v903_v10  ;;  %v923_v13 = vsel %vm913_vm4, %v909_v37, 1326507024  ;;  %vm401_vm6 = vweird.f32 %v1828_v19 }
 0x166   :  { %v400_v15 = vmul.f32 %v399_v29, %v384_v23  ;;  %v409_v38 = vxor.u32 2147483648, %v392_v52  ;;  %v669_v51 = vshll.u32 %v2150_v55, 30  ;;  %v921_v34 = vsel %vm911_vm3, %v918_v17, %v920_v1 }
 0x167   :  { %v924_v23 = vsel %vm912_vm5, %v906_v46, %v923_v13  ;;  %v2174_v39 = vshll.u32 %v886_v59, 8  ;;  %vm405_vm7 = vcmp.eq.s32.totalorder %v2095_v22, 0  ;;  %vm408_vm8 = vcmp.eq.s32.totalorder %v2095_v22, 2 }
 0x168   :  { %v406_v32 = vxor.u32 2147483648, %v400_v15  ;;  %v670_v14 = vsub.s32 %v666_v20, %v669_v51  ;;  %v925_v9 = vsel %vm911_vm3, %v922_v27, %v924_v23  ;;  %vm404_vm9 = vcmp.lt.s32.totalorder %v2095_v22, 2 }
 0x169   :  { %v410_v7 = vsel %vm408_vm8, %v409_v38, %v400_v15  ;;  %v951_v24 = vand.u32 65535, %v921_v34  ;;  %v927_v5 = vand.u32 65535, %v2174_v39  ;;  %v928_v26 = vshrl.u32 %v2174_v39, 16 }
 0x16a   :  { %v407_v6 = vsel %vm405_vm7, %v392_v52, %v406_v32  ;;  %vm671_vm11 = vcmp.lt.s32.totalorder %v670_v14, 0  ;;  %v672_v48 = vsub.s32 0, %v670_v14  ;;  %v929_v3 = vand.u32 65535, %v925_v9 }
 0x16b   :  { %v411_v35 = vsel %vm404_vm9, %v407_v6, %v410_v7  ;;  %v930_v53 = vshrl.u32 %v925_v9, 16  ;;  %v952_v42 = vshrl.u32 %v921_v34, 16  ;;  %v662_v21 = vadd.s32 %v2118_v8, %v2123_v16  ;;  %v92_v34 = vpop.f32.mrf.mxu3 }
 0x16c   :  { %v412_v59 = vsel %vm401_vm6, nan, %v411_v35  ;;  %v673_v40 = vsel %vm671_vm11, %v672_v48, %v670_v14  ;;  %v933_v50 = vmul.u32 %v929_v3, %v928_v26  ;;  %v894_v33 = vshrl.u32 %v1445_v41, %v2120_v56 }
 0x16d   :  { %1344 = vst [vmem:[#allocation2 + $0x8] sm:$0xff] %v412_v59  ;;  %v674_v4 = vclz %v673_v40  ;;  %v932_v22 = vmul.u32 %v930_v53, %v927_v5  ;;  %v931_v25 = vmul.u32 %v929_v3, %v927_v5  ;;  %v955_v44 = vmul.u32 %v951_v24, %v928_v26 }
 0x16e   :  { %v915_v30 = vsel %vm913_vm4, %v903_v10, 2102212464  ;;  %v934_v28 = vmul.u32 %v930_v53, %v928_v26  ;;  %v953_v18 = vmul.u32 %v951_v24, %v927_v5  ;;  %v954_v63 = vmul.u32 %v952_v42, %v927_v5 }
 0x16f   :  { %v1387_v20 = vadd.s32 4294967294, %v674_v4  ;;  %v935_v19 = vshll.u32 %v932_v22, 16  ;;  %v937_v36 = vshll.u32 %v933_v50, 16  ;;  %v956_v16 = vmul.u32 %v952_v42, %v928_v26 }
 0x170   :  { %v957_v29 = vshll.u32 %v954_v63, 16  ;;  %v959_v12 = vshll.u32 %v955_v44, 16  ;;  %v936_v13 = vshrl.u32 %v932_v22, 16  ;;  %v938_v7 = vshrl.u32 %v933_v50, 16 }
 0x171   :  { %vm1388_vm10 = vcmp.lt.s32.totalorder %v1387_v20, 0  ;;  %vm939_vm13 = vc.u32 %v931_v25, %v935_v19  ;;  %v941_v46 = vadd.s32 %v935_v19, %v931_v25  ;;  %v958_v35 = vshrl.u32 %v954_v63, 16 }
 0x172   :  { %v677_v52 = vsel %vm1388_vm10, 0, %v1387_v20  ;;  %v940_v8 = vsel %vm939_vm13, 1, %v1451_v0  ;;  %vm961_vm14 = vc.u32 %v953_v18, %v957_v29  ;;  %v963_v10 = vadd.s32 %v957_v29, %v953_v18 }
 0x173   :  { %v678_v56 = vsub.s32 32, %v677_v52  ;;  %v682_v37 = vsub.s32 4294967266, %v677_v52  ;;  %v942_v17 = vadd.s32 %v940_v8, %v934_v28  ;;  %v679_v15 = vshll.u32 %v670_v14, %v677_v52 }
 0x174   :  { %vm943_vm12 = vc.u32 %v941_v46, %v937_v36  ;;  %v962_v51 = vsel %vm961_vm14, 1, %v1451_v0  ;;  %vm965_vm15 = vc.u32 %v963_v10, %v959_v12  ;;  %v93_v5 = vadd.f32 %v1977_v11, %v92_v34 }
 0x175   :  { %v680_v38 = vshrl.u32 %v662_v21, %v678_v56  ;;  %v683_v1 = vadd.s32 127, %v682_v37  ;;  %v944_v27 = vsel %vm943_vm12, 1, %v1451_v0  ;;  %v964_v23 = vadd.s32 %v962_v51, %v956_v16 }
 0x176   :  { %v946_v32 = vadd.s32 %v944_v27, %v942_v17  ;;  %v966_v24 = vsel %vm965_vm15, 1, %v1451_v0  ;;  %v692_v26 = vsub.s32 4, %v2150_v55  ;;  %v914_v3 = vsel %vm910_vm1, %v894_v33, %v2136_v54 }
 0x177   :  { %v681_v9 = vor.u32 %v680_v38, %v679_v15  ;;  %v684_v6 = vshll.u32 %v683_v1, 23  ;;  %v968_v48 = vadd.s32 %v966_v24, %v964_v23  ;;  %v916_v53 = vsel %vm912_vm5, %v2139_v2, %v915_v30 }
 0x178   :  { %v947_v14 = vadd.s32 %v946_v32, %v936_v13  ;;  %v960_v42 = vshrl.u32 %v955_v44, 16  ;;  %v2203_v22 = vmul.f32 30.0, %v93_v5  ;;  %v967_v20 = vadd.s32 %v963_v10, %v959_v12 }
 0x179   :  { %v685_v59 = vor.u32 4788187, %v684_v6  ;;  %v969_v4 = vadd.s32 %v968_v48, %v958_v35  ;;  %v688_v21 = vcvt.s32.f32 %v681_v9  ;;  %v917_v11 = vsel %vm911_vm3, %v914_v3, %v916_v53 }
 0x17a   :  { %v948_v40 = vadd.s32 %v947_v14, %v938_v7  ;;  %vm570_vm2 = vcmp.lt.s32.totalorder %v1984_v61, 0  ;;  %v1191_v54 = vand.u32 2139095040, %v2203_v22  ;;  %v971_v30 = vmul.u32 %v2174_v39, %v917_v11 }
 0x17b   :  { %v686_v50 = vand.u32 2147483647, %v685_v59  ;;  %v970_v25 = vadd.s32 %v969_v4, %v960_v42  ;;  %v693_v2 = vsel %vm570_vm2, %v692_v26, %v2150_v55  ;;  %vm569_vm1 = vcmp.le.f32.partialorder %v568_v57, 0.7853982 }
 0x17c   :  { %vm973_vm0 = vc.u32 %v948_v40, %v967_v20  ;;  %v1192_v28 = vshrl.u32 %v1191_v54, 23  ;;  %v695_v63 = vsel %vm569_vm1, 0, %v693_v2  ;;  %v1188_v8 = vand.u32 2147483647, %v2203_v22 }
 0x17d   :  { %v689_v19 = vmul.f32 %v688_v21, %v686_v50  ;;  %v974_v33 = vadd.s32 1, %v970_v25  ;;  %v712_v56 = vadd.s32 3, %v695_v63  ;;  %v972_v35 = vadd.s32 %v967_v20, %v948_v40 }
 0x17e   :  { %v1398_v46 = vadd.s32 4294967169, %v1192_v28  ;;  %v1195_v57 = vand.u32 8388607, %v1188_v8  ;;  %vm711_vm8 = vweird.f32 %v1984_v61  ;;  %vm880_vm11 = vcmp.lt.s32.totalorder %v2000_v31, 0 }
 0x17f   :  { %v690_v44 = vxor.u32 2147483648, %v689_v19  ;;  %v975_v18 = vsel %vm973_vm0, %v974_v33, %v970_v25  ;;  %v713_v1 = vand.u32 3, %v712_v56  ;;  %vm2279_vm15 = vcmp.le.f32.partialorder %v878_v62, 0.7853982 }
 0x180   :  { %v976_v36 = vadd.s32 %v975_v18, %v971_v30  ;;  %v1198_v55 = vadd.s32 1, %v1398_v46  ;;  %v1196_v32 = vor.u32 8388608, %v1195_v57 }
 0x181   :  { %v691_v60 = vsel %vm570_vm2, %v690_v44, %v689_v19  ;;  %vm715_vm5 = vcmp.eq.s32.totalorder %v713_v1, 0  ;;  %vm718_vm6 = vcmp.eq.s32.totalorder %v713_v1, 2  ;;  %vm714_vm7 = vcmp.lt.s32.totalorder %v713_v1, 2 }
 0x182   :  { %v694_v52 = vsel %vm569_vm1, %v1984_v61, %v691_v60  ;;  %v977_v29 = vadd.s32 536870912, %v976_v36  ;;  %vm1199_vm3 = vcmp.gt.s32.totalorder %v1198_v55, 0  ;;  %v2227_v3 = vshll.u32 %v1196_v32, 8 }
 0x183   :  { %v696_v16 = vmul.f32 %v694_v52, %v694_v52  ;;  %v1200_v12 = vsel %vm1199_vm3, %v1198_v55, 0 }
 0x184   :  { %v2215_v39 = vshrl.u32 %v977_v29, 30  ;;  %v1202_v27 = vand.u32 31, %v1200_v12  ;;  %v2229_v4 = vshrl.u32 %v1200_v12, 5 }
 0x185   :  { %v697_v37 = vmul.f32 -0.001358992, %v696_v16  ;;  %v704_v17 = vmul.f32 -0.00019511016, %v696_v16 }
 0x186   :  { %v979_v38 = vshll.u32 %v2215_v39, 30  ;;  %v2220_v23 = vsub.s32 32, %v1202_v27  ;;  %v1205_v50 = vshll.u32 %v1445_v41, %v1202_v27  ;;  %v1208_v40 = vshll.u32 %v1446_v43, %v1202_v27 }
 0x187   :  { %v698_v15 = vadd.f32 0.041655596, %v697_v37  ;;  %v705_v10 = vadd.f32 0.008332121, %v704_v17  ;;  %v1211_v20 = vshll.u32 %v1447_v45, %v1202_v27  ;;  %v1214_v54 = vshll.u32 %v1448_v47, %v1202_v27 }
 0x188   :  { %v980_v13 = vsub.s32 %v976_v36, %v979_v38  ;;  %v1206_v59 = vshrl.u32 %v1446_v43, %v2220_v23  ;;  %v1209_v26 = vshrl.u32 %v1447_v45, %v2220_v23  ;;  %v1212_v11 = vshrl.u32 %v1448_v47, %v2220_v23 }
 0x189   :  { %v699_v51 = vmul.f32 %v698_v15, %v696_v16  ;;  %v706_v34 = vmul.f32 %v705_v10, %v696_v16  ;;  %v1215_v2 = vshrl.u32 %v1449_v49, %v2220_v23  ;;  %v1218_v30 = vshrl.u32 %v1450_v58, %v2220_v23 }
 0x18a   :  { %vm981_vm4 = vcmp.lt.s32.totalorder %v980_v13, 0  ;;  %v982_v7 = vsub.s32 0, %v980_v13  ;;  %v1207_v33 = vor.u32 %v1206_v59, %v1205_v50  ;;  %v2239_v44 = vor.u32 %v1209_v26, %v1208_v40 }
 0x18b   :  { %v700_v9 = vadd.f32 -0.4999988, %v699_v51  ;;  %v707_v6 = vadd.f32 -0.16666654, %v706_v34  ;;  %v1216_v45 = vor.u32 %v1215_v2, %v1214_v54  ;;  %v1217_v18 = vshll.u32 %v1449_v49, %v1202_v27 }
 0x18c   :  { %v983_v48 = vsel %vm981_vm4, %v982_v7, %v980_v13  ;;  %v1213_v47 = vor.u32 %v1212_v11, %v1211_v20  ;;  %vm1220_vm10 = vcmp.lt.s32.totalorder %v2229_v4, 1  ;;  %vm1223_vm13 = vcmp.lt.s32.totalorder %v2229_v4, 4 }
 0x18d   :  { %v701_v24 = vmul.f32 %v700_v9, %v696_v16  ;;  %v708_v14 = vmul.f32 %v707_v6, %v696_v16  ;;  %v984_v5 = vclz %v983_v48  ;;  %v1219_v16 = vor.u32 %v1218_v30, %v1217_v18 }
 0x18e   :  { %vm1222_vm12 = vcmp.lt.s32.totalorder %v2229_v4, 3  ;;  %v1228_v56 = vsel %vm1220_vm10, %v1207_v33, %v2239_v44  ;;  %v1229_v37 = vsel %vm1223_vm13, %v1216_v45, 920167782  ;;  %vm1221_vm14 = vcmp.lt.s32.totalorder %v2229_v4, 2 }
 0x18f   :  { %v702_v53 = vadd.f32 1.0, %v701_v24  ;;  %v709_v42 = vadd.f32 1.0, %v708_v14  ;;  %v1393_v21 = vadd.s32 4294967294, %v984_v5  ;;  %v1230_v12 = vsel %vm1222_vm12, %v1213_v47, %v1229_v37 }
 0x190   :  { %v1002_v61 = vsub.s32 4, %v2215_v39  ;;  %v1231_v15 = vsel %vm1221_vm14, %v1228_v56, %v1230_v12  ;;  %v1232_v10 = vsel %vm1220_vm10, %v2239_v44, %v1213_v47  ;;  %v1233_v38 = vsel %vm1223_vm13, %v1219_v16, 1326507024 }
 0x191   :  { %v710_v25 = vmul.f32 %v709_v42, %v694_v52  ;;  %v719_v19 = vxor.u32 2147483648, %v702_v53  ;;  %vm1394_vm9 = vcmp.lt.s32.totalorder %v1393_v21, 0  ;;  %v1234_v27 = vsel %vm1222_vm12, %v1216_v45, %v1233_v38 }
 0x192   :  { %v987_v28 = vsel %vm1394_vm9, 0, %v1393_v21  ;;  %v1237_v51 = vand.u32 65535, %v2227_v3  ;;  %v1261_v34 = vand.u32 65535, %v1231_v15  ;;  %v1235_v32 = vsel %vm1221_vm14, %v1232_v10, %v1234_v27 }
 0x193   :  { %v716_v43 = vxor.u32 2147483648, %v710_v25  ;;  %v988_v60 = vsub.s32 32, %v987_v28  ;;  %v992_v63 = vsub.s32 4294967266, %v987_v28  ;;  %v720_v46 = vsel %vm718_vm6, %v719_v19, %v710_v25 }
 0x194   :  { %v989_v52 = vshll.u32 %v980_v13, %v987_v28  ;;  %v1204_v13 = vshrl.u32 %v1445_v41, %v2220_v23  ;;  %v1238_v9 = vshrl.u32 %v2227_v3, 16  ;;  %v1262_v6 = vshrl.u32 %v1231_v15, 16 }
 0x195   :  { %v717_v36 = vsel %vm715_vm5, %v702_v53, %v716_v43  ;;  %v990_v29 = vshrl.u32 %v972_v35, %v988_v60  ;;  %v993_v55 = vadd.s32 127, %v992_v63  ;;  %v1239_v14 = vand.u32 65535, %v1235_v32 }
 0x196   :  { %v721_v58 = vsel %vm714_vm7, %v717_v36, %v720_v46  ;;  %v1240_v35 = vshrl.u32 %v1235_v32, 16  ;;  %v1003_v41 = vsel %vm880_vm11, %v1002_v61, %v2215_v39  ;;  %v1264_v23 = vmul.u32 %v1262_v6, %v1237_v51 }
 0x197   :  { %v722_v49 = vsel %vm711_vm8, nan, %v721_v58  ;;  %v991_v17 = vor.u32 %v990_v29, %v989_v52  ;;  %v994_v57 = vshll.u32 %v993_v55, 23  ;;  %v1265_v5 = vmul.u32 %v1261_v34, %v1238_v9 }
 0x198   :  { %1346 = vst [vmem:[#allocation2 + $0x18] sm:$0xff] %v722_v49  ;;  %v1224_v26 = vsel %vm1220_vm10, %v1204_v13, %v1207_v33  ;;  %v1242_v53 = vmul.u32 %v1240_v35, %v1237_v51  ;;  %v1243_v42 = vmul.u32 %v1239_v14, %v1238_v9  ;;  %v1225_v50 = vsel %vm1223_vm13, %v1213_v47, 2102212464 }
 0x199   :  { %v995_v1 = vor.u32 4788187, %v994_v57  ;;  %v998_v24 = vcvt.s32.f32 %v991_v17  ;;  %v1263_v21 = vmul.u32 %v1261_v34, %v1237_v51  ;;  %v1266_v62 = vmul.u32 %v1262_v6, %v1238_v9 }
 0x19a   :  { %v1267_v40 = vshll.u32 %v1264_v23, 16  ;;  %v1241_v11 = vmul.u32 %v1239_v14, %v1237_v51  ;;  %v1244_v25 = vmul.u32 %v1240_v35, %v1238_v9  ;;  %v1245_v19 = vshll.u32 %v1242_v53, 16 }
 0x19b   :  { %v996_v7 = vand.u32 2147483647, %v995_v1  ;;  %v1247_v54 = vshll.u32 %v1243_v42, 16  ;;  %v1269_v39 = vshll.u32 %v1265_v5, 16  ;;  %v1226_v36 = vsel %vm1222_vm12, %v2239_v44, %v1225_v50 }
 0x19c   :  { %vm1271_vm2 = vc.u32 %v1263_v21, %v1267_v40  ;;  %v1273_v2 = vadd.s32 %v1267_v40, %v1263_v21  ;;  %vm1249_vm0 = vc.u32 %v1241_v11, %v1245_v19  ;;  %v1251_v33 = vadd.s32 %v1245_v19, %v1241_v11 }
 0x19d   :  { %v999_v59 = vmul.f32 %v998_v24, %v996_v7  ;;  %v1272_v43 = vsel %vm1271_vm2, 1, %v1451_v0  ;;  %v1250_v45 = vsel %vm1249_vm0, 1, %v1451_v0  ;;  %v1268_v52 = vshrl.u32 %v1264_v23, 16 }
 0x19e   :  { %v1274_v18 = vadd.s32 %v1272_v43, %v1266_v62  ;;  %vm1275_vm1 = vc.u32 %v1273_v2, %v1269_v39  ;;  %v1252_v63 = vadd.s32 %v1250_v45, %v1244_v25  ;;  %vm1253_vm3 = vc.u32 %v1251_v33, %v1247_v54 }
 0x19f   :  { %v1000_v20 = vxor.u32 2147483648, %v999_v59  ;;  %v1276_v47 = vsel %vm1275_vm1, 1, %v1451_v0  ;;  %v1254_v46 = vsel %vm1253_vm3, 1, %v1451_v0  ;;  %v1246_v55 = vshrl.u32 %v1242_v53, 16 }
 0x1a0   :  { %v1278_v16 = vadd.s32 %v1276_v47, %v1274_v18  ;;  %v1256_v49 = vadd.s32 %v1254_v46, %v1252_v63  ;;  %v1270_v56 = vshrl.u32 %v1265_v5, 16  ;;  %v1248_v12 = vshrl.u32 %v1243_v42, 16 }
 0x1a1   :  { %v1001_v30 = vsel %vm880_vm11, %v1000_v20, %v999_v59  ;;  %v1005_v15 = vsel %vm2279_vm15, 0, %v1003_v41  ;;  %v1227_v44 = vsel %vm1221_vm14, %v1224_v26, %v1226_v36  ;;  %v1277_v27 = vadd.s32 %v1273_v2, %v1269_v39 }
 0x1a2   :  { %v1004_v28 = vsel %vm2279_vm15, %v2000_v31, %v1001_v30  ;;  %v1279_v37 = vadd.s32 %v1278_v16, %v1268_v52  ;;  %v1257_v61 = vadd.s32 %v1256_v49, %v1246_v55  ;;  %v1281_v32 = vmul.u32 %v2227_v3, %v1227_v44 }
 0x1a3   :  { %v1006_v60 = vmul.f32 %v1004_v28, %v1004_v28  ;;  %v1022_v9 = vadd.s32 3, %v1005_v15  ;;  %vm1021_vm8 = vweird.f32 %v2000_v31  ;;  %vm1190_vm10 = vcmp.lt.s32.totalorder %v2203_v22, 0 }
 0x1a4   :  { %v1280_v10 = vadd.s32 %v1279_v37, %v1270_v56  ;;  %v1258_v1 = vadd.s32 %v1257_v61, %v1248_v12  ;;  %vm1189_vm13 = vcmp.le.f32.partialorder %v1188_v8, 0.7853982  ;;  %vm1331_vm2 = vweird.f32 %v2203_v22 }
 0x1a5   :  { %v1007_v58 = vmul.f32 -0.001358992, %v1006_v60  ;;  %v1014_v29 = vmul.f32 -0.00019511016, %v1006_v60  ;;  %v1023_v41 = vand.u32 3, %v1022_v9 }
 0x1a6   :  { %v1284_v51 = vadd.s32 1, %v1280_v10  ;;  %vm1283_vm4 = vc.u32 %v1258_v1, %v1277_v27  ;;  %v1282_v54 = vadd.s32 %v1277_v27, %v1258_v1 }
 0x1a7   :  { %v1008_v17 = vadd.f32 0.041655596, %v1007_v58  ;;  %v1015_v57 = vadd.f32 0.008332121, %v1014_v29  ;;  %vm1025_vm5 = vcmp.eq.s32.totalorder %v1023_v41, 0  ;;  %vm1028_vm6 = vcmp.eq.s32.totalorder %v1023_v41, 2 }
 0x1a8   :  { %v1285_v6 = vsel %vm1283_vm4, %v1284_v51, %v1280_v10  ;;  %vm1024_vm7 = vcmp.lt.s32.totalorder %v1023_v41, 2 }
 0x1a9   :  { %v1009_v0 = vmul.f32 %v1008_v17, %v1006_v60  ;;  %v1016_v38 = vmul.f32 %v1015_v57, %v1006_v60  ;;  %v1286_v14 = vadd.s32 %v1285_v6, %v1281_v32 }
 0x1ab   :  { %v1010_v34 = vadd.f32 -0.4999988, %v1009_v0  ;;  %v1017_v13 = vadd.f32 -0.16666654, %v1016_v38  ;;  %v1287_v4 = vadd.s32 536870912, %v1286_v14 }
 0x1ad   :  { %v1011_v7 = vmul.f32 %v1010_v34, %v1006_v60  ;;  %v1018_v24 = vmul.f32 %v1017_v13, %v1006_v60  ;;  %v1288_v59 = vshrl.u32 %v1287_v4, 30 }
 0x1af   :  { %v1012_v35 = vadd.f32 1.0, %v1011_v7  ;;  %v1019_v48 = vadd.f32 1.0, %v1018_v24  ;;  %v1289_v53 = vshll.u32 %v1288_v59, 30  ;;  %v1312_v46 = vsub.s32 4, %v1288_v59 }
 0x1b1   :  { %v1020_v23 = vmul.f32 %v1019_v48, %v1004_v28  ;;  %v1029_v5 = vxor.u32 2147483648, %v1012_v35  ;;  %v1290_v50 = vsub.s32 %v1286_v14, %v1289_v53  ;;  %v1313_v55 = vsel %vm1190_vm10, %v1312_v46, %v1288_v59 }
 0x1b2   :  { %v1315_v37 = vsel %vm1189_vm13, 0, %v1313_v55 }
 0x1b3   :  { %v1026_v26 = vxor.u32 2147483648, %v1020_v23  ;;  %v1030_v3 = vsel %vm1028_vm6, %v1029_v5, %v1020_v23  ;;  %vm1291_vm9 = vcmp.lt.s32.totalorder %v1290_v50, 0  ;;  %v1292_v40 = vsub.s32 0, %v1290_v50 }
 0x1b4   :  { %v1332_v15 = vadd.s32 3, %v1315_v37 }
 0x1b5   :  { %v1027_v42 = vsel %vm1025_vm5, %v1012_v35, %v1026_v26  ;;  %v1293_v20 = vsel %vm1291_vm9, %v1292_v40, %v1290_v50 }
 0x1b6   :  { %v1031_v21 = vsel %vm1024_vm7, %v1027_v42, %v1030_v3  ;;  %v1294_v11 = vclz %v1293_v20  ;;  %v1333_v38 = vand.u32 3, %v1332_v15 }
 0x1b7   :  { %v1032_v62 = vsel %vm1021_vm8, nan, %v1031_v21 }
 0x1b8   :  { %1348 = vst [vmem:[#allocation2 + $0x28] sm:$0xff] %v1032_v62  ;;  %v1399_v25 = vadd.s32 4294967294, %v1294_v11  ;;  %vm1335_vm12 = vcmp.eq.s32.totalorder %v1333_v38, 0  ;;  %vm1338_vm14 = vcmp.eq.s32.totalorder %v1333_v38, 2  ;;  %vm1334_vm15 = vcmp.lt.s32.totalorder %v1333_v38, 2 }
 0x1ba   :  { %vm1400_vm11 = vcmp.lt.s32.totalorder %v1399_v25, 0 }
 0x1bb   :  { %v1297_v19 = vsel %vm1400_vm11, 0, %v1399_v25 }
 0x1bc   :  { %v1298_v39 = vsub.s32 32, %v1297_v19  ;;  %v1302_v2 = vsub.s32 4294967266, %v1297_v19  ;;  %v1299_v30 = vshll.u32 %v1290_v50, %v1297_v19 }
 0x1be   :  { %v1300_v33 = vshrl.u32 %v1282_v54, %v1298_v39  ;;  %v1303_v43 = vadd.s32 127, %v1302_v2 }
 0x1c0   :  { %v1301_v28 = vor.u32 %v1300_v33, %v1299_v30  ;;  %v1304_v45 = vshll.u32 %v1303_v43, 23 }
 0x1c2   :  { %v1305_v18 = vor.u32 4788187, %v1304_v45  ;;  %v1308_v60 = vcvt.s32.f32 %v1301_v28 }
 0x1c4   :  { %v1306_v31 = vand.u32 2147483647, %v1305_v18 }
 0x1c6   :  { %v1309_v63 = vmul.f32 %v1308_v60, %v1306_v31 }
 0x1c8   :  { %v1310_v47 = vxor.u32 2147483648, %v1309_v63 }
 0x1ca   :  { %v1311_v36 = vsel %vm1190_vm10, %v1310_v47, %v1309_v63 }
 0x1cb   :  { %v1314_v52 = vsel %vm1189_vm13, %v2203_v22, %v1311_v36 }
 0x1cc   :  { %v1316_v16 = vmul.f32 %v1314_v52, %v1314_v52 }
 0x1ce   :  { %v1317_v58 = vmul.f32 -0.001358992, %v1316_v16  ;;  %v1324_v29 = vmul.f32 -0.00019511016, %v1316_v16 }
 0x1d0   :  { %v1318_v49 = vadd.f32 0.041655596, %v1317_v58  ;;  %v1325_v56 = vadd.f32 0.008332121, %v1324_v29 }
 0x1d2   :  { %v1319_v17 = vmul.f32 %v1318_v49, %v1316_v16  ;;  %v1326_v57 = vmul.f32 %v1325_v56, %v1316_v16 }
 0x1d4   :  { %v1320_v12 = vadd.f32 -0.4999988, %v1319_v17  ;;  %v1327_v61 = vadd.f32 -0.16666654, %v1326_v57 }
 0x1d6   :  { %v1321_v44 = vmul.f32 %v1320_v12, %v1316_v16  ;;  %v1328_v10 = vmul.f32 %v1327_v61, %v1316_v16 }
 0x1d8   :  { %v1322_v0 = vadd.f32 1.0, %v1321_v44  ;;  %v1329_v8 = vadd.f32 1.0, %v1328_v10 }
 0x1da   :  { %v1330_v1 = vmul.f32 %v1329_v8, %v1314_v52  ;;  %v1339_v27 = vxor.u32 2147483648, %v1322_v0 }
 0x1dc   :  { %v1336_v51 = vxor.u32 2147483648, %v1330_v1  ;;  %v1340_v13 = vsel %vm1338_vm14, %v1339_v27, %v1330_v1 }
 0x1de   :  { %v1337_v34 = vsel %vm1335_vm12, %v1322_v0, %v1336_v51 }
 0x1df   :  { %v1341_v32 = vsel %vm1334_vm15, %v1337_v34, %v1340_v13 }
 0x1e0   :  { %v1342_v9 = vsel %vm1331_vm2, nan, %v1341_v32 }
 0x1e1   :  { %1350 = vst [vmem:[#allocation2 + $0x38] sm:$0xff] %v1342_v9 }
 0x1e2   :  { %1363 = dma.vmem_to_hbm [thread:$0]  %s1356_s7, 1024, %s1358_s10, [#allocation3], %s1453_s11, %s1453_s11, %s1454_s12  }
 0x1e3   :  { %1443 = dma.done.wait [#allocation3], 1024  }
 0x1e4   :  { %1444 = vsyncadd [#allocation3], 4294966272 }
 0x1e5   :  { %1368 = vsyncpa [#allocation3], 1 }

</bundles_post_ra>
